<compile_context>
chip_gen: v7x
topology: tpu7x:2x2x1
jax: 0.10.0
libtpu: 0.0.40
codegen_flags: <defaults>
</compile_context>

<pallas_src>
import jax
import jax.numpy as jnp
from jax.experimental import pallas as pl
from jax.experimental.pallas import tpu as pltpu

# ---- problem sizes (small, consistent with the module semantics) ------------
G = 4        # graph-batches per pallas_call (grid size)
B = 8        # graphs per grid step == len(ng_list) chunk
C = 8        # num_context_sample
N = 8        # num_neg_sample
F = 16       # raw point feature dim (output of the embedding-lookup glue)
D = 32       # embed_dim
S = 16       # spa_embed_dim
NFREQ = 4    # sinusoid frequencies used by spa_enc (power of two)
SPA_IN = 4 * NFREQ           # sin/cos of dx,dy at NFREQ frequencies == 16

GB = G * B                   # total number of NeighborGraphs per call
ROWS_PTS = B * C + B + B * N # 136  (ctx ; center ; neg), multiple of 8
PTS_COLS = F + 2             # 18   (features | dx | dy)

# lane-dense output packing: 80 useful rows padded to 96, folded 4-wide
PACK = 4
FULL_ROWS = 96               # 8 pred + 8 center + 64 neg + 16 pad
PAD_ROWS = FULL_ROWS - (2 * B + B * N)
OUT_ROWS = FULL_ROWS // PACK # 24
OUT_LANES = PACK * D         # 128

_HALF_PI = 1.5707963267948966

# ---- weight-slab layout (one packed bf16 operand, lane width 2*D = 64) ------
_W1 = 0                      # (F+SPA_IN, D+S) block-diag [[w_enc,0],[0,w_spa]]  rows 0:32
_W2 = _W1 + F + SPA_IN       # (D+S, 2D) = [[w_ie|w_ke],[w_is|w_ks]]             rows 32:80
_WO = _W2 + D + S            # (D, D)                                            rows 80:112
_B1 = _WO + D                # row 112, cols 0:48  = [b_enc | b_spa]
_B2 = _B1 + 1                # row 113, cols 0:64  = [b_i   | b_k]
_BO = _B2 + 1                # row 114, cols 0:32  = b_o
W_ROWS = 128                 # padded (multiple of the bf16 sublane tile)


def _neigh_graph_kernel(pts_ref, w_ref, out_ref):
    f32 = jnp.float32
    bf16 = jnp.bfloat16

    pts = pts_ref[...]                               # (136, 18) f32
    feats = pts[:, 0:F]                              # (136, 16)

    # ---- static slices of the packed bf16 weight slab -----------------------
    w1 = w_ref[_W1:_W1 + F + SPA_IN, 0:D + S]        # (32, 48)
    w2 = w_ref[_W2:_W2 + D + S, 0:2 * D]             # (48, 64)
    w_o = w_ref[_WO:_WO + D, 0:D]                    # (32, 32)
    b1 = w_ref[_B1:_B1 + 1, 0:D + S].astype(f32)     # (1, 48)
    b2 = w_ref[_B2:_B2 + 1, 0:2 * D].astype(f32)     # (1, 64)
    b_o = w_ref[_BO:_BO + 1, 0:D].astype(f32)        # (1, 32)

    # ---- spa_enc sinusoid: ONE EUP sin pass over all 16 lanes ---------------
    dx = pts[0:B * C, F:F + 1]                       # (64, 1)
    dy = pts[0:B * C, F + 1:F + 2]                   # (64, 1)
    lane = jax.lax.broadcasted_iota(jnp.int32, (1, SPA_IN), 1)
    k = lane & (NFREQ - 1)                           # frequency index 0..3
    freq = ((1 + (k & 1)) * jnp.where((k & 2) > 0, 4, 1)).astype(f32)   # exact [1,2,4,8]
    phase = jnp.where((lane & NFREQ) > 0, _HALF_PI, 0.0).astype(f32)    # cos = sin(x+pi/2)
    base = jnp.where(lane >= 2 * NFREQ, dy, dx)                          # dx / dy per lane
    spa_in = jnp.sin(base * freq + phase)                                # (64, 16) f32

    # ---- enc() + spa_enc() FFN fused as one block-diagonal matmul -----------
    spa_pad = jnp.concatenate(
        [spa_in, jnp.zeros((ROWS_PTS - B * C, SPA_IN), f32)], axis=0)    # (136, 16)
    a = jnp.concatenate([feats, spa_pad], axis=-1).astype(bf16)          # (136, 32)
    es = jnp.dot(a, w1, preferred_element_type=f32) + b1                 # (136, 48)
    enc_out = es[:, 0:D]                                                 # (136, 32)

    # ctx rows: [key_embeds | relu(key_spa)] -- ReLU only on the spa lanes
    lane48 = jax.lax.broadcasted_iota(jnp.int32, (1, D + S), 1)
    ctx_mix = es[0:B * C, :]                                             # (64, 48)
    ctx_mix = jnp.where(lane48 >= D, jnp.maximum(ctx_mix, 0.0), ctx_mix)

    # ---- fused init_dec + dec key projection: single (64,48)x(48,64) matmul -
    proj = jnp.dot(ctx_mix.astype(bf16), w2, preferred_element_type=f32) + b2
    init_h = proj[:, 0:D]                                                # (64, 32)
    k_h = proj[:, D:2 * D]                                               # (64, 32)

    # init_dec(): mean-pool over context points -> init query
    init_query = jnp.mean(init_h.reshape(B, C, D), axis=1)               # (B, D)

    # dec(): single-head attention over context points (query = init_query)
    # TODO(synk): dec is constructor-injected; modeled GAT-style (leaky slope
    # 0.2, no 1/sqrt(D) score scaling) -- adjust if the concrete dec differs.
    scores = jnp.sum(k_h.reshape(B, C, D) * init_query.reshape(B, 1, D), axis=-1)
    scores = jnp.where(scores > 0.0, scores, 0.2 * scores)               # (B, C)
    m = jnp.max(scores, axis=-1, keepdims=True)
    e = jnp.exp(scores - m)
    attn = e * pl.reciprocal(jnp.sum(e, axis=-1, keepdims=True), approx=True)
    key_embeds = enc_out[0:B * C, :].reshape(B, C, D)
    ctx_agg = jnp.sum(key_embeds * attn[:, :, None], axis=1)             # (B, D)
    center_pred = (jnp.dot(ctx_agg.astype(bf16), w_o, preferred_element_type=f32)
                   + b_o + init_query)                                   # (B, D)

    # ---- lane-dense output: (96,32) -> (24,128) via 4 contiguous row chunks -
    full = jnp.concatenate(
        [center_pred,                       # rows  0:8   center_pred
         enc_out[B * C:ROWS_PTS, :],        # rows  8:80  center_embed ; neg
         jnp.zeros((PAD_ROWS, D), f32)],    # rows 80:96  padding
        axis=0)                                                          # (96, 32)
    out_ref[...] = jnp.concatenate(
        [full[j * OUT_ROWS:(j + 1) * OUT_ROWS] for j in range(PACK)], axis=-1)


def neigh_graph_forward(pts_slab, w_slab):
    """pts_slab (G, ROWS_PTS, PTS_COLS) f32, w_slab (W_ROWS, 2*D) bf16."""
    g = pts_slab.shape[0]
    out = pl.pallas_call(
        _neigh_graph_kernel,
        out_shape=jax.ShapeDtypeStruct((g, OUT_ROWS, OUT_LANES), jnp.float32),
        grid=(g,),
        in_specs=[
            pl.BlockSpec((None, ROWS_PTS, PTS_COLS), lambda i: (i, 0, 0)),
            pl.BlockSpec((W_ROWS, 2 * D), lambda i: (0, 0)),   # resident
        ],
        out_specs=pl.BlockSpec((None, OUT_ROWS, OUT_LANES), lambda i: (i, 0, 0)),
        compiler_params=pltpu.CompilerParams(
            dimension_semantics=("parallel",)),
    )(pts_slab, w_slab)

    # undo the lane packing: 4 lane chunks of width D -> 96 rows of width D
    full = jnp.concatenate([out[:, :, j * D:(j + 1) * D] for j in range(PACK)],
                           axis=1)                                       # (G, 96, D)
    center_pred = full[:, 0:B].reshape(-1, D)                            # (GB, D)
    center_embed = full[:, B:2 * B].reshape(-1, D)                       # (GB, D)
    neg_embeds = full[:, 2 * B:2 * B + B * N].reshape(-1, N, D)          # (GB, N, D)
    return center_pred, center_embed, neg_embeds


def pack_inputs(ctx_feats, coords, center_feats, neg_feats):
    """Pack per-graph features + ctx coords into one (G, 136, 18) f32 slab.

    TODO(synk): in production the upstream embedding-lookup glue should write
    directly into this layout (or donate the buffer); here the pack is a
    one-off outside the kernel's critical path.
    """
    gb = ctx_feats.shape[0]
    g = gb // B
    ctx = ctx_feats.reshape(g, B * C, F)
    cen = center_feats.reshape(g, B, F)
    neg = neg_feats.reshape(g, B * N, F)
    feats = jnp.concatenate([ctx, cen, neg], axis=1).astype(jnp.float32)  # (G,136,F)
    crd = jnp.zeros((g, ROWS_PTS, 2), jnp.float32)
    crd = crd.at[:, 0:B * C, :].set(coords.reshape(g, B * C, 2))
    return jnp.concatenate([feats, crd], axis=-1)                         # (G,136,18)


def init_params(key):
    ks = jax.random.split(key, 8)
    scale = 0.1
    return {
        "w_enc": scale * jax.random.normal(ks[0], (F, D), jnp.float32),
        "b_enc": jnp.zeros((1, D), jnp.float32),
        "w_spa": scale * jax.random.normal(ks[1], (SPA_IN, S), jnp.float32),
        "b_spa": jnp.zeros((1, S), jnp.float32),
        "w_ie": scale * jax.random.normal(ks[2], (D, D), jnp.float32),
        "w_is": scale * jax.random.normal(ks[3], (S, D), jnp.float32),
        "b_i": jnp.zeros((1, D), jnp.float32),
        "w_ke": scale * jax.random.normal(ks[4], (D, D), jnp.float32),
        "w_ks": scale * jax.random.normal(ks[5], (S, D), jnp.float32),
        "b_k": jnp.zeros((1, D), jnp.float32),
        "w_o": scale * jax.random.normal(ks[6], (D, D), jnp.float32),
        "b_o": jnp.zeros((1, D), jnp.float32),
    }


def pack_weights(p):
    """Pack the 12 weight/bias tensors into one (W_ROWS, 2*D) bf16 slab."""
    slab = jnp.zeros((W_ROWS, 2 * D), jnp.float32)
    # W1 block-diagonal: rows 0:16 = [w_enc | 0], rows 16:32 = [0 | w_spa]
    slab = slab.at[_W1:_W1 + F, 0:D].set(p["w_enc"])
    slab = slab.at[_W1 + F:_W1 + F + SPA_IN, D:D + S].set(p["w_spa"])
    # W2: rows 32:64 = [w_ie | w_ke], rows 64:80 = [w_is | w_ks]
    slab = slab.at[_W2:_W2 + D, 0:D].set(p["w_ie"])
    slab = slab.at[_W2:_W2 + D, D:2 * D].set(p["w_ke"])
    slab = slab.at[_W2 + D:_W2 + D + S, 0:D].set(p["w_is"])
    slab = slab.at[_W2 + D:_W2 + D + S, D:2 * D].set(p["w_ks"])
    # output projection + biases
    slab = slab.at[_WO:_WO + D, 0:D].set(p["w_o"])
    slab = slab.at[_B1, 0:D].set(p["b_enc"][0])
    slab = slab.at[_B1, D:D + S].set(p["b_spa"][0])
    slab = slab.at[_B2, 0:D].set(p["b_i"][0])
    slab = slab.at[_B2, D:2 * D].set(p["b_k"][0])
    slab = slab.at[_BO, 0:D].set(p["b_o"][0])
    return slab.astype(jnp.bfloat16)


def reference_forward(ctx_feats, coords, center_feats, neg_feats, p):
    """Pure-JAX reference of the modeled forward pass (for correctness check)."""
    freqs = 2.0 ** jnp.arange(NFREQ, dtype=jnp.float32)
    dx = coords[..., 0:1] * freqs
    dy = coords[..., 1:2] * freqs
    spa_in = jnp.concatenate(
        [jnp.sin(dx), jnp.cos(dx), jnp.sin(dy), jnp.cos(dy)], axis=-1)    # (GB,C,SPA_IN)
    key_embeds = ctx_feats @ p["w_enc"] + p["b_enc"]                      # (GB,C,D)
    center_embed = center_feats @ p["w_enc"] + p["b_enc"]                 # (GB,D)
    neg_embeds = neg_feats @ p["w_enc"] + p["b_enc"]                      # (GB,N,D)
    key_spa = jnp.maximum(spa_in @ p["w_spa"] + p["b_spa"], 0.0)          # (GB,C,S)
    init_h = key_embeds @ p["w_ie"] + key_spa @ p["w_is"] + p["b_i"]
    init_query = jnp.mean(init_h, axis=1)                                 # (GB,D)
    k_proj = key_embeds @ p["w_ke"] + key_spa @ p["w_ks"] + p["b_k"]
    scores = jnp.sum(k_proj * init_query[:, None, :], axis=-1)
    scores = jnp.where(scores > 0.0, scores, 0.2 * scores)
    attn = jax.nn.softmax(scores, axis=-1)
    ctx_agg = jnp.sum(key_embeds * attn[:, :, None], axis=1)
    center_pred = ctx_agg @ p["w_o"] + p["b_o"] + init_query
    return center_pred, center_embed, neg_embeds


if __name__ == "__main__":
    key = jax.random.PRNGKey(0)
    k_ctx, k_coord, k_cen, k_neg, k_par = jax.random.split(key, 5)

    # TODO(synk): NeighborGraph sampling (sample_neighbor / sample_neg) and the
    # point-feature embedding lookup are host-side Python; their deterministic
    # synthetic outputs are fed directly.
    ctx_feats = jax.random.normal(k_ctx, (GB, C, F), jnp.float32)     # context point features
    coords = jax.random.uniform(k_coord, (GB, C, 2), jnp.float32,
                                minval=-1.0, maxval=1.0)              # (deltaX, deltaY)
    center_feats = jax.random.normal(k_cen, (GB, F), jnp.float32)     # center point features
    neg_feats = jax.random.normal(k_neg, (GB, N, F), jnp.float32)     # negative samples

    params = init_params(k_par)
    w_slab = pack_weights(params)
    pts_slab = pack_inputs(ctx_feats, coords, center_feats, neg_feats)

    pred, cen, neg = neigh_graph_forward(pts_slab, w_slab)
    jax.block_until_ready((pred, cen, neg))

    assert pred.shape == (GB, D)
    assert cen.shape == (GB, D)
    assert neg.shape == (GB, N, D)

    # Cross-check vs pure-JAX reference (loose tol: bf16 MXU operands + approx rcp).
    r_pred, r_cen, r_neg = reference_forward(ctx_feats, coords, center_feats,
                                             neg_feats, params)
    assert float(jnp.max(jnp.abs(pred - r_pred))) < 2e-2
    assert float(jnp.max(jnp.abs(cen - r_cen))) < 2e-2
    assert float(jnp.max(jnp.abs(neg - r_neg))) < 2e-2

    print("KERNEL_OK")
</pallas_src>

<mosaic_0001>
module attributes {stable_mosaic.version = 11 : i64} {
  func.func @_neigh_graph_kernel(%arg0: i32, %arg1: memref<1x136x18xf32, #tpu.memory_space<vmem>>, %arg2: memref<128x64xbf16, #tpu.memory_space<vmem>>, %arg3: memref<1x24x128xf32, #tpu.memory_space<vmem>>) attributes {dimension_semantics = [#tpu.dimension_semantics<parallel>], iteration_bounds = array<i64: 4>, scalar_prefetch = 0 : i64, scratch_operands = 0 : i64, tpu.core_type = #tpu.core_type<tc>, window_params = [{transform_indices = @transform_0, window_bounds = array<i64: 1, 136, 18>}, {pipeline_mode = #tpu.pipeline_mode<synchronous>, transform_indices = @transform_1, window_bounds = array<i64: 128, 64>}, {transform_indices = @transform_2, window_bounds = array<i64: 1, 24, 128>}]} {
    %c0 = arith.constant 0 : index
    %c0_0 = arith.constant 0 : index
    %c0_1 = arith.constant 0 : index
    %0 = vector.load %arg1[%c0, %c0_0, %c0_1] : memref<1x136x18xf32, #tpu.memory_space<vmem>>, vector<1x136x18xf32>
    %1 = vector.shape_cast %0 : vector<1x136x18xf32> to vector<136x18xf32>
    %2 = vector.extract_strided_slice %1 {offsets = [0, 0], sizes = [136, 16], strides = [1, 1]} : vector<136x18xf32> to vector<136x16xf32>
    %c0_2 = arith.constant 0 : index
    %c0_3 = arith.constant 0 : index
    %3 = vector.load %arg2[%c0_2, %c0_3] : memref<128x64xbf16, #tpu.memory_space<vmem>>, vector<32x48xbf16>
    %c32 = arith.constant 32 : index
    %c0_4 = arith.constant 0 : index
    %4 = vector.load %arg2[%c32, %c0_4] : memref<128x64xbf16, #tpu.memory_space<vmem>>, vector<48x64xbf16>
    %c80 = arith.constant 80 : index
    %c0_5 = arith.constant 0 : index
    %5 = vector.load %arg2[%c80, %c0_5] : memref<128x64xbf16, #tpu.memory_space<vmem>>, vector<32x32xbf16>
    %c112 = arith.constant 112 : index
    %c0_6 = arith.constant 0 : index
    %6 = vector.load %arg2[%c112, %c0_6] : memref<128x64xbf16, #tpu.memory_space<vmem>>, vector<1x48xbf16>
    %7 = arith.extf %6 : vector<1x48xbf16> to vector<1x48xf32>
    %c113 = arith.constant 113 : index
    %c0_7 = arith.constant 0 : index
    %8 = vector.load %arg2[%c113, %c0_7] : memref<128x64xbf16, #tpu.memory_space<vmem>>, vector<1x64xbf16>
    %9 = arith.extf %8 : vector<1x64xbf16> to vector<1x64xf32>
    %c114 = arith.constant 114 : index
    %c0_8 = arith.constant 0 : index
    %10 = vector.load %arg2[%c114, %c0_8] : memref<128x64xbf16, #tpu.memory_space<vmem>>, vector<1x32xbf16>
    %11 = arith.extf %10 : vector<1x32xbf16> to vector<1x32xf32>
    %12 = vector.extract_strided_slice %1 {offsets = [0, 16], sizes = [64, 1], strides = [1, 1]} : vector<136x18xf32> to vector<64x1xf32>
    %13 = vector.extract_strided_slice %1 {offsets = [0, 17], sizes = [64, 1], strides = [1, 1]} : vector<136x18xf32> to vector<64x1xf32>
    %14 = tpu.iota {dimensions = array<i32: 1>} : vector<1x16xi32>
    %c3_i32 = arith.constant 3 : i32
    %15 = vector.broadcast %c3_i32 : i32 to vector<1x16xi32>
    %16 = arith.andi %14, %15 : vector<1x16xi32>
    %c1_i32 = arith.constant 1 : i32
    %17 = vector.broadcast %c1_i32 : i32 to vector<1x16xi32>
    %18 = arith.andi %16, %17 : vector<1x16xi32>
    %c1_i32_9 = arith.constant 1 : i32
    %19 = vector.broadcast %c1_i32_9 : i32 to vector<1x16xi32>
    %20 = arith.addi %19, %18 : vector<1x16xi32>
    %c2_i32 = arith.constant 2 : i32
    %21 = vector.broadcast %c2_i32 : i32 to vector<1x16xi32>
    %22 = arith.andi %16, %21 : vector<1x16xi32>
    %c0_i32 = arith.constant 0 : i32
    %23 = vector.broadcast %c0_i32 : i32 to vector<1x16xi32>
    %24 = arith.cmpi sgt, %22, %23 : vector<1x16xi32>
    %c4_i32 = arith.constant 4 : i32
    %c1_i32_10 = arith.constant 1 : i32
    %25 = vector.broadcast %c4_i32 : i32 to vector<1x16xi32>
    %26 = vector.broadcast %c1_i32_10 : i32 to vector<1x16xi32>
    %27 = arith.select %24, %25, %26 : vector<1x16xi1>, vector<1x16xi32>
    %28 = arith.muli %20, %27 : vector<1x16xi32>
    %29 = arith.sitofp %28 : vector<1x16xi32> to vector<1x16xf32>
    %c4_i32_11 = arith.constant 4 : i32
    %30 = vector.broadcast %c4_i32_11 : i32 to vector<1x16xi32>
    %31 = arith.andi %14, %30 : vector<1x16xi32>
    %c0_i32_12 = arith.constant 0 : i32
    %32 = vector.broadcast %c0_i32_12 : i32 to vector<1x16xi32>
    %33 = arith.cmpi sgt, %31, %32 : vector<1x16xi32>
    %cst = arith.constant 1.57079637 : f32
    %cst_13 = arith.constant 0.000000e+00 : f32
    %34 = vector.broadcast %cst : f32 to vector<1x16xf32>
    %35 = vector.broadcast %cst_13 : f32 to vector<1x16xf32>
    %36 = arith.select %33, %34, %35 : vector<1x16xi1>, vector<1x16xf32>
    %c8_i32 = arith.constant 8 : i32
    %37 = vector.broadcast %c8_i32 : i32 to vector<1x16xi32>
    %38 = arith.cmpi sge, %14, %37 : vector<1x16xi32>
    %39 = vector.shape_cast %38 : vector<1x16xi1> to vector<1x16xi1>
    %40 = vector.broadcast %39 : vector<1x16xi1> to vector<64x16xi1>
    %41 = vector.shape_cast %13 : vector<64x1xf32> to vector<64x1xf32>
    %42 = vector.broadcast %41 : vector<64x1xf32> to vector<64x16xf32>
    %43 = vector.shape_cast %12 : vector<64x1xf32> to vector<64x1xf32>
    %44 = vector.broadcast %43 : vector<64x1xf32> to vector<64x16xf32>
    %45 = arith.select %40, %42, %44 : vector<64x16xi1>, vector<64x16xf32>
    %46 = vector.broadcast %29 : vector<1x16xf32> to vector<64x16xf32>
    %47 = arith.mulf %45, %46 : vector<64x16xf32>
    %48 = vector.broadcast %36 : vector<1x16xf32> to vector<64x16xf32>
    %49 = arith.addf %47, %48 : vector<64x16xf32>
    %50 = math.sin %49 : vector<64x16xf32>
    %cst_14 = arith.constant 0.000000e+00 : f32
    %51 = vector.broadcast %cst_14 : f32 to vector<72x16xf32>
    %52 = tpu.concatenate %50, %51 in 0 : vector<64x16xf32>, vector<72x16xf32> -> vector<136x16xf32>
    %53 = tpu.concatenate %2, %52 in 1 : vector<136x16xf32>, vector<136x16xf32> -> vector<136x32xf32>
    %54 = arith.truncf %53 : vector<136x32xf32> to vector<136x32xbf16>
    %cst_15 = arith.constant dense<0.000000e+00> : vector<136x48xf32>
    %55 = tpu.matmul %54, %3, %cst_15 {dimension_numbers = #tpu.dot_dimension_numbers<[1], [0], [0], [1], [0, 0, 1, 1], [], []>} : vector<136x32xbf16>, vector<32x48xbf16>, vector<136x48xf32> -> vector<136x48xf32>
    %56 = vector.broadcast %7 : vector<1x48xf32> to vector<136x48xf32>
    %57 = arith.addf %55, %56 : vector<136x48xf32>
    %58 = vector.extract_strided_slice %57 {offsets = [0, 0], sizes = [136, 32], strides = [1, 1]} : vector<136x48xf32> to vector<136x32xf32>
    %59 = tpu.iota {dimensions = array<i32: 1>} : vector<1x48xi32>
    %60 = vector.extract_strided_slice %57 {offsets = [0, 0], sizes = [64, 48], strides = [1, 1]} : vector<136x48xf32> to vector<64x48xf32>
    %c32_i32 = arith.constant 32 : i32
    %61 = vector.broadcast %c32_i32 : i32 to vector<1x48xi32>
    %62 = arith.cmpi sge, %59, %61 : vector<1x48xi32>
    %cst_16 = arith.constant 0.000000e+00 : f32
    %63 = vector.broadcast %cst_16 : f32 to vector<64x48xf32>
    %64 = arith.maximumf %60, %63 : vector<64x48xf32>
    %65 = vector.shape_cast %62 : vector<1x48xi1> to vector<1x48xi1>
    %66 = vector.broadcast %65 : vector<1x48xi1> to vector<64x48xi1>
    %67 = arith.select %66, %64, %60 : vector<64x48xi1>, vector<64x48xf32>
    %68 = arith.truncf %67 : vector<64x48xf32> to vector<64x48xbf16>
    %cst_17 = arith.constant dense<0.000000e+00> : vector<64x64xf32>
    %69 = tpu.matmul %68, %4, %cst_17 {dimension_numbers = #tpu.dot_dimension_numbers<[1], [0], [0], [1], [0, 0, 1, 1], [], []>} : vector<64x48xbf16>, vector<48x64xbf16>, vector<64x64xf32> -> vector<64x64xf32>
    %70 = vector.broadcast %9 : vector<1x64xf32> to vector<64x64xf32>
    %71 = arith.addf %69, %70 : vector<64x64xf32>
    %72 = vector.extract_strided_slice %71 {offsets = [0, 0], sizes = [64, 32], strides = [1, 1]} : vector<64x64xf32> to vector<64x32xf32>
    %73 = vector.extract_strided_slice %71 {offsets = [0, 32], sizes = [64, 32], strides = [1, 1]} : vector<64x64xf32> to vector<64x32xf32>
    %74 = vector.shape_cast %72 : vector<64x32xf32> to vector<8x8x32xf32>
    %cst_18 = arith.constant dense<0.000000e+00> : vector<8x32xf32>
    %75 = vector.multi_reduction <add>, %74, %cst_18 [1] : vector<8x8x32xf32> to vector<8x32xf32>
    %cst_19 = arith.constant 8.000000e+00 : f32
    %76 = vector.broadcast %cst_19 : f32 to vector<8x32xf32>
    %77 = arith.divf %75, %76 : vector<8x32xf32>
    %78 = vector.shape_cast %73 : vector<64x32xf32> to vector<8x8x32xf32>
    %79 = vector.shape_cast %77 : vector<8x32xf32> to vector<8x1x32xf32>
    %80 = vector.broadcast %79 : vector<8x1x32xf32> to vector<8x8x32xf32>
    %81 = arith.mulf %78, %80 : vector<8x8x32xf32>
    %cst_20 = arith.constant dense<0.000000e+00> : vector<8x8xf32>
    %82 = vector.multi_reduction <add>, %81, %cst_20 [2] : vector<8x8x32xf32> to vector<8x8xf32>
    %cst_21 = arith.constant 0.000000e+00 : f32
    %83 = vector.broadcast %cst_21 : f32 to vector<8x8xf32>
    %84 = arith.cmpf ogt, %82, %83 : vector<8x8xf32>
    %cst_22 = arith.constant 2.000000e-01 : f32
    %85 = vector.broadcast %cst_22 : f32 to vector<8x8xf32>
    %86 = arith.mulf %85, %82 : vector<8x8xf32>
    %87 = arith.select %84, %82, %86 : vector<8x8xi1>, vector<8x8xf32>
    %cst_23 = arith.constant dense<0xFF800000> : vector<8xf32>
    %88 = vector.multi_reduction <maximumf>, %87, %cst_23 [1] : vector<8x8xf32> to vector<8xf32>
    %89 = vector.shape_cast %88 : vector<8xf32> to vector<8x1xf32>
    %90 = vector.broadcast %89 : vector<8x1xf32> to vector<8x8xf32>
    %91 = arith.subf %87, %90 : vector<8x8xf32>
    %92 = math.exp %91 : vector<8x8xf32>
    %cst_24 = arith.constant dense<0.000000e+00> : vector<8xf32>
    %93 = vector.multi_reduction <add>, %92, %cst_24 [1] : vector<8x8xf32> to vector<8xf32>
    %94 = vector.shape_cast %93 : vector<8xf32> to vector<8x1xf32>
    %95 = tpu.reciprocal %94 {approx = true} : vector<8x1xf32> -> vector<8x1xf32>
    %96 = vector.broadcast %95 : vector<8x1xf32> to vector<8x8xf32>
    %97 = arith.mulf %92, %96 : vector<8x8xf32>
    %98 = vector.extract_strided_slice %58 {offsets = [0, 0], sizes = [64, 32], strides = [1, 1]} : vector<136x32xf32> to vector<64x32xf32>
    %99 = vector.shape_cast %98 : vector<64x32xf32> to vector<8x8x32xf32>
    %100 = vector.shape_cast %97 : vector<8x8xf32> to vector<8x8x1xf32>
    %101 = vector.broadcast %100 : vector<8x8x1xf32> to vector<8x8x32xf32>
    %102 = arith.mulf %99, %101 : vector<8x8x32xf32>
    %cst_25 = arith.constant dense<0.000000e+00> : vector<8x32xf32>
    %103 = vector.multi_reduction <add>, %102, %cst_25 [1] : vector<8x8x32xf32> to vector<8x32xf32>
    %104 = arith.truncf %103 : vector<8x32xf32> to vector<8x32xbf16>
    %cst_26 = arith.constant dense<0.000000e+00> : vector<8x32xf32>
    %105 = tpu.matmul %104, %5, %cst_26 {dimension_numbers = #tpu.dot_dimension_numbers<[1], [0], [0], [1], [0, 0, 1, 1], [], []>} : vector<8x32xbf16>, vector<32x32xbf16>, vector<8x32xf32> -> vector<8x32xf32>
    %106 = vector.broadcast %11 : vector<1x32xf32> to vector<8x32xf32>
    %107 = arith.addf %105, %106 : vector<8x32xf32>
    %108 = arith.addf %107, %77 : vector<8x32xf32>
    %109 = vector.extract_strided_slice %58 {offsets = [64, 0], sizes = [72, 32], strides = [1, 1]} : vector<136x32xf32> to vector<72x32xf32>
    %cst_27 = arith.constant 0.000000e+00 : f32
    %110 = vector.broadcast %cst_27 : f32 to vector<16x32xf32>
    %111 = tpu.concatenate %108, %109, %110 in 0 : vector<8x32xf32>, vector<72x32xf32>, vector<16x32xf32> -> vector<96x32xf32>
    %112 = vector.extract_strided_slice %111 {offsets = [0, 0], sizes = [24, 32], strides = [1, 1]} : vector<96x32xf32> to vector<24x32xf32>
    %113 = vector.extract_strided_slice %111 {offsets = [24, 0], sizes = [24, 32], strides = [1, 1]} : vector<96x32xf32> to vector<24x32xf32>
    %114 = vector.extract_strided_slice %111 {offsets = [48, 0], sizes = [24, 32], strides = [1, 1]} : vector<96x32xf32> to vector<24x32xf32>
    %115 = vector.extract_strided_slice %111 {offsets = [72, 0], sizes = [24, 32], strides = [1, 1]} : vector<96x32xf32> to vector<24x32xf32>
    %116 = tpu.concatenate %112, %113, %114, %115 in 1 : vector<24x32xf32>, vector<24x32xf32>, vector<24x32xf32>, vector<24x32xf32> -> vector<24x128xf32>
    %c0_28 = arith.constant 0 : index
    %c0_29 = arith.constant 0 : index
    %c0_30 = arith.constant 0 : index
    %117 = vector.load %arg3[%c0_28, %c0_29, %c0_30] : memref<1x24x128xf32, #tpu.memory_space<vmem>>, vector<1x24x128xf32>
    %118 = vector.shape_cast %117 : vector<1x24x128xf32> to vector<24x128xf32>
    %119 = vector.shape_cast %116 : vector<24x128xf32> to vector<1x24x128xf32>
    tpu.vector_store %arg3[%c0_28, %c0_29, %c0_30], %119 {strides = array<i32>} : memref<1x24x128xf32, #tpu.memory_space<vmem>>, vector<1x24x128xf32>,
    return
  }
  func.func @transform_0(%arg0: i32) -> (i32, i32, i32) {
    %c0_i32 = arith.constant 0 : i32
    %c0_i32_0 = arith.constant 0 : i32
    %c0_i32_1 = arith.constant 0 : i32
    return %arg0, %c0_i32, %c0_i32_0 : i32, i32, i32
  }
  func.func @transform_1(%arg0: i32) -> (i32, i32) {
    %c0_i32 = arith.constant 0 : i32
    %c0_i32_0 = arith.constant 0 : i32
    %c0_i32_1 = arith.constant 0 : i32
    return %c0_i32, %c0_i32_0 : i32, i32
  }
  func.func @transform_2(%arg0: i32) -> (i32, i32, i32) {
    %c0_i32 = arith.constant 0 : i32
    %c0_i32_0 = arith.constant 0 : i32
    %c0_i32_1 = arith.constant 0 : i32
    return %arg0, %c0_i32, %c0_i32_0 : i32, i32, i32
  }
}

</mosaic_0001>

<bundles_post_ra>
// kernel: tpu_custom_call.1
= control target key start
LH: loop header
LB: loop body
LE: loop exit
PB: predicated region body
PF: predicated region fallthrough
CT: control target
= control target key end

     0   :  { %7 = vsyncpa [#allocation3], 0  ;;  %s4160_s0 = inlined_call_operand.vmem [shape: f32[4,136,18], index: 0, kind: input, shape index: {}]   ;;  %s4161_s1 = inlined_call_operand.vmem [shape: bf16[128,64], index: 1, kind: input, shape index: {}]   ;;  %s4162_s2 = inlined_call_operand.hbm [shape: f32[4,24,128], index: 2, kind: output, shape index: {}]  }
   0x1   :  { %9 = vsyncpa [#allocation3 + $0x1], 0  ;;  %s2651_s9 = smov 0   ;;  %s2653_s10 = smov 0  }
   0x2   :  { %s2655_s11 = smov 0   ;;  %s2657_s12 = smov 0  }
   0x3 LB: > { %s2672_s13 = sadd.s32 4294967295, %s2615_s12   ;;  %s2215_s14 = sadd.s32 4294967294, %s2615_s12   ;;  %s2615_s12 = sphi %s2657_s12, %s4259_s12   ;;  %s2611_s11 = sphi %s2655_s11, %s4258_s11   ;;  %s2607_s10 = sphi %s2653_s10, %s4257_s10   ;;  %s2603_s9 = sphi %s2651_s9, %s4256_s9  }
   0x4   : > { %s2676_s15 = sadd.s32 1, %s2615_s12   ;;  %s69_s16 = sadd.s32 1, %s2611_s11 }
   0x5   : > { %s66_s17 = ssub.s32 %s2615_s12, %s2676_s15  ;;  %p79_p0 = scmp.ne.s32.totalorder %s2611_s11, %s2607_s10 }
   0x6   : > { %p67_p1 = scmp.eq.s32.totalorder %s66_s17, 0  ;;  %p80_p2 = scmp.eq.s32.totalorder %s2672_s13, 3 }
   0x7   : > { %p85_p3 = scmp.ne.s32.totalorder %s2607_s10, %s2603_s9  ;;  %p86_p4 = scmp.eq.s32.totalorder %s2215_s14, 3 }
   0x8   : > { %s2687_s18 = scalar_select %p67_p1, %s2611_s11, %s69_s16  }
   0x9   : > { %p2689_p5 = por %p80_p2, %p79_p0  ;;  %p2693_p6 = por %p86_p4, %p85_p3 }
   0xa   : > { %p2218_p7 = scmp.ge.s32.totalorder %s2615_s12, 1  ;;  %p115_p8 = scmp.lt.s32.totalorder %s2615_s12, 5 }
   0xc   : > { %p116_p9 = pnand %p2218_p7, %p115_p8 }
   0xe   : > { %119 = sbr.rel (%p116_p9) target bundleno = 2249 (0x8c9), region = 28 }
  0x15   : > { %p137_p10 = scmp.lt.s32.totalorder %s2672_s13, 3  ;;  %v2617_v0 = vmov 16   ;;  %v2618_v1 = vmov 17   ;;  %v4164_v4 = vmov 0.0   ;;  %v4163_v11 = vlaneseq  ;;  %s2627_s30 = smov 16  }
  0x16   : > { %2456 = vset.pattern.permute.xlu1 %v2617_v0  ;;  %2455 = vset.pattern.permute.xlu0 %v2618_v1  ;;  %v2620_v17 = vmov 1   ;;  %s2629_s17 = smov 32   ;;  %s134_s27 = sand.u32 1, %s2607_s10  }
  0x17   : > { %s138_s21 = scalar_select %p137_p10, %s2672_s13, 3  ;;  %2297 = vmatprep.subr.bf16.mxu0 %v4164_v4  ;;  %2359 = vmatprep.subr.bf16.mxu1 %v4164_v4  ;;  %v2717_v12 = vand.u32 127, %v4163_v11 }
  0x18   : > { %s2363_s28 = smul.u32 24, %s134_s27  ;;  %s2633_s16 = smov [#allocation2]  }
  0x19   : > { %s2364_s22 = smul.u32 136, %s138_s21  ;;  %4203 = vst [vmem:[#allocation5_spill] sm:$0xff] %v2717_v12  ;;  %v180_v13 = vand.u32 3, %v2717_v12  ;;  %v188_v20 = vand.u32 4, %v2717_v12  ;;  %vm191_vm2 = vcmp.ge.s32.totalorder %v2717_v12, 8  ;;  %s2630_s21 = smov 96  }
  0x1a   : > { %s136_s29 = scalar_lea.vmem [#allocation2], %s2363_s28  ;;  %s2397_s5 = smul.u32 384, %s2672_s13 }
  0x1b   : > { %s2704_s25 = scalar_lea.vmem %s4160_s0, %s2364_s22  ;;  %v183_v14 = vand.u32 2, %v180_v13  ;;  %v181_v15 = vand.u32 1, %v180_v13  ;;  %vm189_vm1 = vcmp.gt.s32.totalorder %v188_v20, 0  ;;  %v4180_v20 = vmov 1326507024   ;;  %s2632_s22 = smov 64  }
  0x1c   : > { %v143_v2 = vld [vmem:[%s2704_s25] sm:$0xff]  ;;  %v144_v3 = vld [vmem:[%s2704_s25 + $0x8] sm:$0xff]  ;;  %v146_v5 = vld [vmem:[%s2704_s25 + $0x18] sm:$0xff]  ;;  %v2725_v24 = vsel %vm189_vm1, 1.5707964, %v4164_v4  ;;  %s2153_s4 = sshll.u32 %s136_s29, 4  ;;  %s4114_s8 = scalar_lea.hbm %s4162_s2, %s2397_s5  ;;  %s4106_s4 = int_to_ptr.vmem [resolvable:$true] %s2153_s4 }
  0x1d   : > { %235 = vperm.xlu1 %2456, %v143_v2   ;;  %196 = vperm.xlu0 %2455, %v143_v2   ;;  %v145_v6 = vld [vmem:[%s2704_s25 + $0x10] sm:$0xff]  ;;  %v148_v7 = vld [vmem:[%s2704_s25 + $0x28] sm:$0xff]  ;;  %v147_v8 = vld [vmem:[%s2704_s25 + $0x20] sm:$0xff]  ;;  %vm184_vm0 = vcmp.gt.s32.totalorder %v183_v14, 0  ;;  %v182_v16 = vadd.s32 1, %v181_v15  ;;  %s4119_s13 = scalar_lea.sflag [#allocation3], %s134_s27 }
  0x1e   : > { %v149_v9 = vld [vmem:[%s2704_s25 + $0x30] sm:$0xff]  ;;  %v150_v10 = vld [vmem:[%s2704_s25 + $0x38] sm:$0xff]  ;;  %v185_v18 = vsel %vm184_vm0, 4, %v2620_v17  ;;  %s2553_s14 = scalar_lea.vmem %s4106_s4, 384 }
  0x1f   : > { %v186_v19 = vmul.u32 %v185_v18, %v182_v16  ;;  %v4176_v18 = vmov 920167782   ;;  %p2554_p11 = scmp.ne.s32.totalorder %s4106_s4, %s2553_s14 }
  0x21   : > { %239 = vperm.xlu1 %2456, %v144_v3   ;;  %201 = vperm.xlu0 %2455, %v144_v3   ;;  %v2721_v21 = vcvt.s32.f32 %v186_v19  ;;  %p2555_p12 = pnand %p2554_p11, %p2689_p5 }
  0x23   : > { %p2556_p13 = pneg %p2555_p12 }
  0x25   : > { %2457 = vset.pattern.permute.xlu1 %v2618_v1  ;;  %2458 = vset.pattern.permute.xlu0 %v2617_v0 }
  0x26   : > { %211 = vperm.xlu1 %2457, %v146_v5   ;;  %243 = vperm.xlu0 %2458, %v145_v6  }
  0x2a   : > { %2460 = vset.pattern.permute.xlu1 %v2617_v0  ;;  %2459 = vset.pattern.permute.xlu0 %v2618_v1 }
  0x2b   : > { %247 = vperm.xlu1 %2460, %v146_v5   ;;  %206 = vperm.xlu0 %2459, %v145_v6  }
  0x2f   : > { %2461 = vset.pattern.permute.xlu1 %v2618_v1  ;;  %221 = vperm.xlu0 %2459, %v148_v7  }
  0x30   : > { %216 = vperm.xlu1 %2461, %v147_v8  }
  0x33   : > { %226 = vperm.xlu0 %2459, %v149_v9  }
  0x34   : > { %2462 = vset.pattern.permute.xlu1 %v2617_v0 }
  0x35   : > { %251 = vperm.xlu1 %2462, %v147_v8  }
  0x37   : > { %2464 = vset.pattern.permute.xlu0 %v2617_v0 }
  0x38   : > { %259 = vperm.xlu0 %2464, %v149_v9  }
  0x39   : > { %255 = vperm.xlu1 %2462, %v148_v7  }
  0x3d   : > { %2463 = vset.pattern.permute.xlu1 %v2618_v1 }
  0x3e   : > { %231 = vperm.xlu1 %2463, %v150_v10  }
  0x42   : > { %2465 = vset.pattern.permute.xlu1 %v2617_v0 }
  0x43   : > { %263 = vperm.xlu1 %2465, %v150_v10  }
  0x9c   : > { %v236_v22 = vpop.permute.xlu1 %235  ;;  %v197_v23 = vpop.permute.xlu0 %196 }
  0x9d   : > { %v266_v25 = vsel %vm191_vm2, %v197_v23, %v236_v22 }
  0x9e   : > { %v274_v26 = vmul.f32 %v266_v25, %v2721_v21 }
  0xa0   : > { %v2731_v27 = vadd.f32 %v274_v26, %v2725_v24  ;;  %v240_v28 = vpop.permute.xlu1 %239  ;;  %v202_v29 = vpop.permute.xlu0 %201 }
  0xa1   : > { %v267_v30 = vsel %vm191_vm2, %v202_v29, %v240_v28 }
  0xa2   : > { %v293_v31 = vand.u32 2139095040, %v2731_v27  ;;  %v275_v32 = vmul.f32 %v267_v30, %v2721_v21  ;;  %v4167_v53 = vand.u32 2147483647, %v2731_v27 }
  0xa4   : > { %v294_v33 = vshrl.u32 %v293_v31, 23  ;;  %v2738_v34 = vadd.f32 %v275_v32, %v2725_v24  ;;  %v297_v59 = vand.u32 8388607, %v4167_v53  ;;  %v4168_v31 = vmov 2102212464  }
  0xa5   : > { %v212_v35 = vpop.permute.xlu1 %211  ;;  %v244_v36 = vpop.permute.xlu0 %243 }
  0xa6   : > { %v2220_v37 = vadd.s32 4294967169, %v294_v33  ;;  %v397_v38 = vand.u32 2139095040, %v2738_v34  ;;  %v4166_v54 = vand.u32 2147483647, %v2738_v34  ;;  %v298_v6 = vor.u32 8388608, %v297_v59 }
  0xa8   : > { %v300_v39 = vadd.s32 1, %v2220_v37  ;;  %v398_v40 = vshrl.u32 %v397_v38, 23  ;;  %v401_v60 = vand.u32 8388607, %v4166_v54  ;;  %v2790_v29 = vshll.u32 %v298_v6, 8 }
  0xa9   : > { %v4212_v54 = vmov 920167782  }
  0xaa   : > { %v2224_v41 = vadd.s32 4294967169, %v398_v40  ;;  %v248_v42 = vpop.permute.xlu1 %247  ;;  %v207_v43 = vpop.permute.xlu0 %206  ;;  %vm301_vm3 = vcmp.gt.s32.totalorder %v300_v39, 0  ;;  %v402_v7 = vor.u32 8388608, %v401_v60 }
  0xab   : > { %v269_v44 = vsel %vm191_vm2, %v212_v35, %v248_v42  ;;  %v268_v45 = vsel %vm191_vm2, %v207_v43, %v244_v36  ;;  %v302_v50 = vsel %vm301_vm3, %v300_v39, 0 }
  0xac   : > { %v277_v46 = vmul.f32 %v269_v44, %v2721_v21  ;;  %v276_v47 = vmul.f32 %v268_v45, %v2721_v21  ;;  %v404_v48 = vadd.s32 1, %v2224_v41  ;;  %v2755_v56 = vand.u32 31, %v302_v50 }
  0xad   : > { %v2776_v15 = vshrl.u32 %v302_v50, 5  ;;  %v2792_v30 = vshll.u32 %v402_v7, 8  ;;  %v4172_v44 = vmov 683565275  }
  0xae   : > { %v222_v49 = vpop.permute.xlu0 %221  ;;  %v2748_v51 = vadd.f32 %v277_v46, %v2725_v24  ;;  %v2753_v55 = vadd.f32 %v276_v47, %v2725_v24  ;;  %vm405_vm4 = vcmp.gt.s32.totalorder %v404_v48, 0  ;;  %v2766_v1 = vsub.s32 32, %v2755_v56 }
  0xaf   : > { %v217_v52 = vpop.permute.xlu1 %216  ;;  %v406_v63 = vsel %vm405_vm4, %v404_v48, 0  ;;  %v316_v32 = vshll.u32 %v4168_v31, %v2755_v56  ;;  %v319_v33 = vshll.u32 %v4176_v18, %v2755_v56  ;;  %vm325_vm5 = vcmp.lt.s32.totalorder %v2776_v15, 4 }
  0xb0   : > { %v605_v58 = vand.u32 2139095040, %v2748_v51  ;;  %v501_v61 = vand.u32 2139095040, %v2753_v55  ;;  %v2769_v8 = vand.u32 31, %v406_v63  ;;  %v317_v19 = vshrl.u32 %v4176_v18, %v2766_v1 }
  0xb1   : > { %v320_v22 = vshrl.u32 %v4180_v20, %v2766_v1  ;;  %v2801_v37 = vshrl.u32 %v406_v63, 5  ;;  %v307_v45 = vshll.u32 %v4172_v44, %v2755_v56  ;;  %v2814_v47 = vshrl.u32 %v4172_v44, %v2766_v1 }
  0xb2   : > { %v227_v57 = vpop.permute.xlu0 %226  ;;  %v606_v3 = vshrl.u32 %v605_v58, 23  ;;  %v502_v9 = vshrl.u32 %v501_v61, 23  ;;  %v2799_v35 = vsub.s32 32, %v2769_v8  ;;  %v2807_v42 = vor.u32 %v317_v19, %v316_v32 }
  0xb3   : > { %v321_v43 = vor.u32 %v320_v22, %v319_v33  ;;  %v4174_v48 = vmov 2475754826   ;;  %v420_v60 = vshll.u32 %v4168_v31, %v2769_v8  ;;  %v423_v61 = vshll.u32 %v4176_v18, %v2769_v8 }
  0xb4   : > { %v252_v62 = vpop.permute.xlu1 %251  ;;  %v2232_v26 = vadd.s32 4294967169, %v606_v3  ;;  %v2228_v36 = vadd.s32 4294967169, %v502_v9  ;;  %v310_v50 = vshll.u32 %v4174_v48, %v2755_v56  ;;  %vm429_vm6 = vcmp.lt.s32.totalorder %v2801_v37, 4 }
  0xb5   : > { %v270_v0 = vsel %vm191_vm2, %v217_v52, %v252_v62  ;;  %v421_v52 = vshrl.u32 %v4176_v18, %v2799_v35  ;;  %v2831_v63 = vsel %vm325_vm5, %v2807_v42, 920167782  ;;  %v424_v6 = vshrl.u32 %v4180_v20, %v2799_v35 }
  0xb6   : > { %v278_v2 = vmul.f32 %v270_v0, %v2721_v21  ;;  %v612_v46 = vadd.s32 1, %v2232_v26  ;;  %v2835_v0 = vsel %vm325_vm5, %v321_v43, 1326507024  ;;  %v4170_v22 = vmov 2131351028  }
  0xb7   : > { %v260_v5 = vpop.permute.xlu0 %259  ;;  %v425_v33 = vor.u32 %v424_v6, %v423_v61  ;;  %vm322_vm12 = vcmp.lt.s32.totalorder %v2776_v15, 1  ;;  %vm323_vm13 = vcmp.lt.s32.totalorder %v2776_v15, 2  ;;  %vm324_vm14 = vcmp.lt.s32.totalorder %v2776_v15, 3 }
  0xb8   : > { %v2772_v10 = vadd.f32 %v278_v2, %v2725_v24  ;;  %v272_v13 = vsel %vm191_vm2, %v227_v57, %v260_v5  ;;  %v256_v14 = vpop.permute.xlu1 %255  ;;  %v508_v57 = vadd.s32 1, %v2228_v36  ;;  %vm613_vm7 = vcmp.gt.s32.totalorder %v612_v46, 0 }
  0xb9   : > { %v280_v16 = vmul.f32 %v272_v13, %v2721_v21  ;;  %v271_v17 = vsel %vm191_vm2, %v222_v49, %v256_v14  ;;  %v308_v49 = vshrl.u32 %v4174_v48, %v2766_v1  ;;  %v2841_v13 = vor.u32 %v421_v52, %v420_v60 }
  0xba   : > { %4204 = vst [vmem:[#allocation6_spill] sm:$0xff] %v2772_v10  ;;  %v709_v23 = vand.u32 2139095040, %v2772_v10  ;;  %v279_v25 = vmul.f32 %v271_v17, %v2721_v21  ;;  %vm509_vm8 = vcmp.gt.s32.totalorder %v508_v57, 0  ;;  %v336_v48 = vsel %vm324_vm14, %v2807_v42, %v2835_v0 }
  0xbb   : > { %v2788_v28 = vadd.f32 %v280_v16, %v2725_v24  ;;  %v309_v19 = vor.u32 %v308_v49, %v307_v45  ;;  %v510_v36 = vsel %vm509_vm8, %v508_v57, 0  ;;  %v313_v45 = vshll.u32 %v4170_v22, %v2755_v56 }
  0xbc   : > { %v710_v38 = vshrl.u32 %v709_v23, 23  ;;  %v2805_v40 = vadd.f32 %v279_v25, %v2725_v24  ;;  %v311_v23 = vshrl.u32 %v4170_v22, %v2766_v1  ;;  %v614_v25 = vsel %vm613_vm7, %v612_v46, 0 }
  0xbd   : > { %4205 = vst [vmem:[#allocation7_spill] sm:$0xff] %v2788_v28  ;;  %v917_v39 = vand.u32 2139095040, %v2788_v28  ;;  %v232_v41 = vpop.permute.xlu1 %231  ;;  %v314_v46 = vshrl.u32 %v4168_v31, %v2766_v1  ;;  %v2873_v57 = vand.u32 31, %v510_v36  ;;  %v2889_v60 = vshrl.u32 %v614_v25, 5 }
  0xbe   : > { %4206 = vst [vmem:[#allocation8_spill] sm:$0xff] %v2805_v40  ;;  %v2236_v58 = vadd.s32 4294967169, %v710_v38  ;;  %v813_v62 = vand.u32 2139095040, %v2805_v40  ;;  %v312_v61 = vor.u32 %v311_v23, %v310_v50  ;;  %v326_v53 = vsel %vm322_vm12, %v2814_v47, %v309_v19 }
  0xbf   : > { %v918_v59 = vshrl.u32 %v917_v39, 23  ;;  %v2920_v23 = vsub.s32 32, %v2873_v57  ;;  %vm637_vm15 = vcmp.lt.s32.totalorder %v2889_v60, 4  ;;  %vm426_vm3 = vcmp.lt.s32.totalorder %v2801_v37, 1 }
  0xc0   : > { %v716_v2 = vadd.s32 1, %v2236_v58  ;;  %v814_v7 = vshrl.u32 %v813_v62, 23  ;;  %v2894_v62 = vshrl.u32 %v510_v36, 5  ;;  %v330_v36 = vsel %vm322_vm12, %v309_v19, %v312_v61 }
  0xc1   : > { %v2244_v3 = vadd.s32 4294967169, %v918_v59  ;;  %v2887_v59 = vsel %vm429_vm6, %v425_v33, 1326507024  ;;  %v2929_v33 = vshll.u32 %v4176_v18, %v2873_v57  ;;  %v528_v42 = vshrl.u32 %v4180_v20, %v2920_v23 }
  0xc2   : > { %v264_v5 = vpop.permute.xlu1 %263  ;;  %vm717_vm9 = vcmp.gt.s32.totalorder %v716_v2, 0  ;;  %v2240_v17 = vadd.s32 4294967169, %v814_v7  ;;  %vm533_vm1 = vcmp.lt.s32.totalorder %v2894_v62, 4  ;;  %vm428_vm4 = vcmp.lt.s32.totalorder %v2801_v37, 3 }
  0xc3   : > { %v273_v9 = vsel %vm191_vm2, %v232_v41, %v264_v5  ;;  %v924_v14 = vadd.s32 1, %v2244_v3  ;;  %v2843_v16 = vsel %vm717_vm9, %v716_v2, 0  ;;  %v2856_v41 = vsel %vm429_vm6, %v2841_v13, 920167782 }
  0xc4   : > { %v2848_v26 = vand.u32 31, %v2843_v16  ;;  %v281_v32 = vmul.f32 %v273_v9, %v2721_v21  ;;  %v820_v39 = vadd.s32 1, %v2240_v17  ;;  %v2865_v21 = vand.u32 31, %v614_v25 }
  0xc5   : > { %vm925_vm10 = vcmp.gt.s32.totalorder %v924_v14, 0  ;;  %v315_v5 = vor.u32 %v314_v46, %v313_v45 }
  0xc6   : > { %v2851_v38 = vsel %vm925_vm10, %v924_v14, 0  ;;  %v2859_v43 = vsub.s32 32, %v2848_v26  ;;  %vm821_vm11 = vcmp.gt.s32.totalorder %v820_v39, 0  ;;  %v2871_v52 = vadd.f32 %v281_v32, %v2725_v24 }
  0xc7   : > { %v2868_v49 = vand.u32 31, %v2851_v38  ;;  %v2877_v58 = vshll.u32 %v4176_v18, %v2848_v26  ;;  %v2883_v1 = vsel %vm821_vm11, %v820_v39, 0  ;;  %v2902_v6 = vsub.s32 32, %v2865_v21 }
  0xc8   : > { %4208 = vst [vmem:[#allocation10_spill] sm:$0xff] %v2871_v52  ;;  %v2881_v56 = vshrl.u32 %v4180_v20, %v2859_v43  ;;  %v2899_v3 = vand.u32 31, %v2883_v1  ;;  %v1021_v50 = vand.u32 2139095040, %v2871_v52  ;;  %v628_v14 = vshll.u32 %v4168_v31, %v2865_v21 }
  0xc9   : > { %4207 = vst [vmem:[#allocation9_spill] sm:$0xff] %v2868_v49  ;;  %v2892_v24 = vsub.s32 32, %v2868_v49  ;;  %v2906_v7 = vshll.u32 %v4176_v18, %v2868_v49  ;;  %v2917_v17 = vshll.u32 %v4176_v18, %v2865_v21  ;;  %v524_v32 = vshll.u32 %v4168_v31, %v2873_v57 }
  0xca   : > { %v2923_v25 = vsub.s32 32, %v2899_v3  ;;  %v2936_v39 = vshll.u32 %v4176_v18, %v2899_v3  ;;  %v1022_v46 = vshrl.u32 %v1021_v50, 23  ;;  %v327_v11 = vsel %vm325_vm5, %v315_v5, 2102212464 }
  0xcb   : > { %4209 = vst [vmem:[#allocation11_spill] sm:$0xff] %v2892_v24  ;;  %v2910_v9 = vshrl.u32 %v4180_v20, %v2892_v24  ;;  %v629_v4 = vshrl.u32 %v4176_v18, %v2902_v6  ;;  %v332_v31 = vsel %vm324_vm14, %v315_v5, %v2831_v63  ;;  %v328_v50 = vsel %vm324_vm14, %v312_v61, %v327_v11 }
  0xcc   : > { %4210 = vst [vmem:[#allocation12_spill] sm:$0xff] %v2936_v39  ;;  %v2940_v45 = vshrl.u32 %v4180_v20, %v2923_v25  ;;  %v2248_v2 = vadd.s32 4294967169, %v1022_v46  ;;  %v333_v22 = vsel %vm323_vm13, %v330_v36, %v332_v31  ;;  %v334_v44 = vsel %vm322_vm12, %v312_v61, %v315_v5 }
  0xcd   : > { %v632_v18 = vshrl.u32 %v4180_v20, %v2902_v6  ;;  %v525_v46 = vshrl.u32 %v4212_v54, %v2920_v23  ;;  %v337_v47 = vsel %vm323_vm13, %v334_v44, %v336_v48  ;;  %v329_v0 = vsel %vm323_vm13, %v326_v53, %v328_v50 }
  0xce   : > { %4211 = vst [vmem:[#allocation13_spill] sm:$0xff] %v2940_v45  ;;  %v1028_v12 = vadd.s32 1, %v2248_v2  ;;  %v2964_v11 = vmul.u32.u64.low %v2790_v29, %v337_v47  ;;  %v2965_v63 = vmul.u32.u64.high %v2790_v29, %v337_v47, %v2964_v11  ;;  %v4213_v61 = vmov 2475754826  }
  0xcf   : > { %v2968_v31 = vmul.u32.u64.low %v2790_v29, %v333_v22  ;;  %v2969_v19 = vmul.u32.u64.high %v2790_v29, %v333_v22, %v2968_v31  ;;  %v412_v2 = vshrl.u32 %v4213_v61, %v2799_v35  ;;  %v4215_v48 = vmov 683565275  }
  0xd0   : > { %vm1029_vm0 = vcmp.gt.s32.totalorder %v1028_v12, 0  ;;  %v411_v5 = vshll.u32 %v4215_v48, %v2769_v8  ;;  %v414_v22 = vshll.u32 %v4213_v61, %v2769_v8  ;;  %v4216_v36 = vmov 2131351028  }
  0xd1   : > { %v2978_v44 = vsel %vm1029_vm0, %v1028_v12, 0  ;;  %v415_v47 = vshrl.u32 %v4216_v36, %v2799_v35  ;;  %v2986_v11 = vor.u32 %v629_v4, %v628_v14  ;;  %v417_v53 = vshll.u32 %v4216_v36, %v2769_v8 }
  0xd2   : > { %4214 = vst [vmem:[#allocation14_spill] sm:$0xff] %v2978_v44  ;;  %v2989_v20 = vand.u32 31, %v2978_v44  ;;  %v4217_v12 = vmov 2102212464   ;;  %vm347_vm2 = vc.u32 %v2965_v63, %v2968_v31  ;;  %v348_v50 = vadd.s32 1, %v2969_v19 }
  0xd3   : > { %v418_v15 = vshrl.u32 %v4217_v12, %v2799_v35  ;;  %v413_v52 = vor.u32 %v412_v2, %v411_v5  ;;  %v416_v28 = vor.u32 %v415_v47, %v414_v22  ;;  %v633_v4 = vor.u32 %v632_v18, %v2917_v17 }
  0xd4   : > { %v3000_v14 = vor.u32 %v525_v46, %v524_v32  ;;  %v3003_v40 = vsub.s32 32, %v2989_v20  ;;  %v345_v8 = vmul.u32 %v2790_v29, %v329_v0  ;;  %v529_v44 = vor.u32 %v528_v42, %v2929_v33 }
  0xd5   : > { %v3009_v10 = vshll.u32 %v4212_v54, %v2989_v20  ;;  %v349_v39 = vsel %vm347_vm2, %v348_v50, %v2969_v19  ;;  %v419_v45 = vor.u32 %v418_v15, %v417_v53  ;;  %v4220_v2 = vmov 1326507024  }
  0xd6   : > { %4218 = vst [vmem:[#allocation15_spill] sm:$0xff] %v3003_v40  ;;  %v3014_v5 = vshrl.u32 %v4220_v2, %v3003_v40  ;;  %v350_v18 = vadd.s32 %v349_v39, %v345_v8  ;;  %v3021_v29 = vsel %vm637_vm15, %v2986_v11, 920167782  ;;  %v434_v32 = vsel %vm426_vm3, %v413_v52, %v416_v28 }
  0xd7   : > { %4219 = vst [vmem:[#allocation16_spill] sm:$0xff] %v3009_v10  ;;  %v431_v17 = vsel %vm429_vm6, %v419_v45, 2102212464  ;;  %v436_v33 = vsel %vm428_vm4, %v419_v45, %v2856_v41  ;;  %v410_v39 = vshrl.u32 %v4215_v48, %v2799_v35  ;;  %vm427_vm5 = vcmp.lt.s32.totalorder %v2801_v37, 2 }
  0xd8   : > { %4221 = vst [vmem:[#allocation17_spill] sm:$0xff] %v3014_v5  ;;  %v351_v19 = vadd.s32 536870912, %v350_v18  ;;  %v3033_v42 = vsel %vm637_vm15, %v633_v4, 1326507024  ;;  %v437_v0 = vsel %vm427_vm5, %v434_v32, %v436_v33  ;;  %v438_v22 = vsel %vm426_vm3, %v416_v28, %v419_v45 }
  0xd9   : > { %v440_v41 = vsel %vm428_vm4, %v2841_v13, %v2887_v59  ;;  %v430_v53 = vsel %vm426_vm3, %v410_v39, %v413_v52  ;;  %v432_v15 = vsel %vm428_vm4, %v416_v28, %v431_v17  ;;  %v539_v45 = vsel %vm533_vm1, %v3000_v14, 920167782 }
  0xda   : > { %v352_v47 = vshrl.u32 %v351_v19, 30  ;;  %v441_v50 = vsel %vm427_vm5, %v438_v22, %v440_v41  ;;  %v3046_v4 = vmul.u32.u64.low %v2792_v30, %v437_v0  ;;  %v3047_v2 = vmul.u32.u64.high %v2792_v30, %v437_v0, %v3046_v4 }
  0xdb   : > { %v3042_v35 = vmul.u32.u64.low %v2792_v30, %v441_v50  ;;  %v3043_v8 = vmul.u32.u64.high %v2792_v30, %v441_v50, %v3042_v35  ;;  %v4192_v52 = vand.u32 2147483647, %v2753_v55  ;;  %v543_v28 = vsel %vm533_vm1, %v529_v44, 1326507024 }
  0xdc   : > { %v353_v13 = vshll.u32 %v352_v47, 30  ;;  %v3057_v59 = vshrl.u32 %v2843_v16, 5  ;;  %v732_v17 = vshll.u32 %v4217_v12, %v2848_v26  ;;  %v433_v32 = vsel %vm427_vm5, %v430_v53, %v432_v15 }
  0xdd   : > { %v3064_v33 = vshrl.u32 %v2851_v38, 5  ;;  %v515_v39 = vshll.u32 %v4215_v48, %v2873_v57  ;;  %v516_v44 = vshrl.u32 %v4213_v61, %v2920_v23  ;;  %v733_v16 = vshrl.u32 %v4212_v54, %v2859_v43 }
  0xde   : > { %v3066_v19 = vsub.s32 %v350_v18, %v353_v13  ;;  %v941_v0 = vshrl.u32 %v4212_v54, %v2892_v24  ;;  %vm292_vm6 = vcmp.lt.s32.totalorder %v2731_v27, 0  ;;  %vm451_vm7 = vc.u32 %v3043_v8, %v3046_v4 }
  0xdf   : > { %v452_v37 = vadd.s32 1, %v3047_v2  ;;  %v940_v38 = vshll.u32 %v4217_v12, %v2868_v49  ;;  %v449_v22 = vmul.u32 %v2792_v30, %v433_v32  ;;  %v505_v41 = vand.u32 8388607, %v4192_v52 }
  0xe0   : > { %v356_v18 = vsub.s32 0, %v3066_v19  ;;  %v518_v15 = vshll.u32 %v4213_v61, %v2873_v57  ;;  %v519_v50 = vshrl.u32 %v4216_v36, %v2920_v23  ;;  %v521_v35 = vshll.u32 %v4216_v36, %v2873_v57 }
  0xe1   : > { %v453_v53 = vsel %vm451_vm7, %v452_v37, %v3047_v2  ;;  %v4222_v13 = vand.u32 2147483647, %v2731_v27  ;;  %v517_v52 = vor.u32 %v516_v44, %v515_v39  ;;  %v522_v2 = vshrl.u32 %v4217_v12, %v2920_v23 }
  0xe2   : > { %v2221_v30 = vmin.u32 %v356_v18, %v3066_v19  ;;  %v454_v32 = vadd.s32 %v453_v53, %v449_v22  ;;  %v3102_v37 = vor.u32 %v733_v16, %v732_v17  ;;  %v3104_v10 = vor.u32 %v941_v0, %v940_v38 }
  0xe3   : > { %vm3095_vm8 = vcmp.le.f32.partialorder %v4222_v13, 0.7853982  ;;  %v3107_v5 = vshrl.u32 %v2883_v1, 5  ;;  %v520_v57 = vor.u32 %v519_v50, %v518_v15  ;;  %v376_v13 = vsub.s32 4, %v352_v47 }
  0xe4   : > { %v358_v24 = vclz %v2221_v30  ;;  %v506_v49 = vor.u32 8388608, %v505_v41  ;;  %v514_v40 = vshrl.u32 %v4215_v48, %v2920_v23  ;;  %vm741_vm9 = vcmp.lt.s32.totalorder %v3057_v59, 4 }
  0xe5   : > { %v455_v39 = vadd.s32 536870912, %v454_v32  ;;  %v523_v44 = vor.u32 %v522_v2, %v521_v35  ;;  %vm530_vm10 = vcmp.lt.s32.totalorder %v2894_v62, 1  ;;  %vm532_vm11 = vcmp.lt.s32.totalorder %v2894_v62, 3 }
  0xe6   : > { %vm949_vm12 = vcmp.lt.s32.totalorder %v3064_v33, 4  ;;  %v2222_v17 = vadd.s32 4294967294, %v358_v24  ;;  %vm531_vm13 = vcmp.lt.s32.totalorder %v2894_v62, 2  ;;  %v538_v1 = vsel %vm530_vm10, %v517_v52, %v520_v57 }
  0xe7   : > { %v544_v23 = vsel %vm532_vm11, %v3000_v14, %v543_v28  ;;  %v456_v16 = vshrl.u32 %v455_v39, 30  ;;  %v535_v0 = vsel %vm533_vm1, %v523_v44, 2102212464  ;;  %v540_v38 = vsel %vm532_vm11, %v523_v44, %v539_v45 }
  0xe8   : > { %v542_v18 = vsel %vm530_vm10, %v520_v57, %v523_v44  ;;  %v346_v24 = vadd.s32 %v2968_v31, %v2965_v63  ;;  %vm2223_vm14 = vcmp.lt.s32.totalorder %v2222_v17, 0  ;;  %v377_v22 = vsel %vm292_vm6, %v376_v13, %v352_v47 }
  0xe9   : > { %vm396_vm0 = vcmp.lt.s32.totalorder %v2738_v34, 0  ;;  %v545_v14 = vsel %vm531_vm13, %v542_v18, %v544_v23  ;;  %v361_v28 = vsel %vm2223_vm14, 0, %v2222_v17  ;;  %v457_v41 = vshll.u32 %v456_v16, 30 }
  0xea   : > { %v534_v45 = vsel %vm530_vm10, %v514_v40, %v517_v52  ;;  %v546_v53 = vshll.u32 %v506_v49, 8  ;;  %v362_v15 = vsub.s32 32, %v361_v28  ;;  %v366_v50 = vsub.s32 4294967266, %v361_v28 }
  0xeb   : > { %v536_v63 = vsel %vm532_vm11, %v520_v57, %v535_v0  ;;  %v541_v31 = vsel %vm531_vm13, %v538_v1, %v540_v38  ;;  %v379_v47 = vsel %vm3095_vm8, 0, %v377_v22  ;;  %v3142_v35 = vsub.s32 %v454_v32, %v457_v41 }
  0xec   : > { %v3144_v30 = vmul.u32.u64.low %v546_v53, %v545_v14  ;;  %v3145_v2 = vmul.u32.u64.high %v546_v53, %v545_v14, %v3144_v30  ;;  %v363_v13 = vshll.u32 %v3066_v19, %v361_v28  ;;  %v364_v40 = vshrl.u32 %v346_v24, %v362_v15 }
  0xed   : > { %v367_v49 = vadd.s32 127, %v366_v50  ;;  %v480_v52 = vsub.s32 4, %v456_v16  ;;  %v460_v39 = vsub.s32 0, %v3142_v35  ;;  %v537_v57 = vsel %vm531_vm13, %v534_v45, %v536_v63 }
  0xee   : > { %v3151_v44 = vmul.u32.u64.low %v546_v53, %v541_v31  ;;  %v3152_v17 = vmul.u32.u64.high %v546_v53, %v541_v31, %v3151_v44  ;;  %v3158_v32 = vsel %vm741_vm9, %v3102_v37, 920167782  ;;  %v4225_v19 = vor.u32 %v2881_v56, %v2877_v58 }
  0xef   : > { %v365_v23 = vor.u32 %v364_v40, %v363_v13  ;;  %v368_v0 = vshll.u32 %v367_v49, 23  ;;  %v4226_v62 = vand.u32 2147483647, %v2738_v34  ;;  %v3176_v18 = vsel %vm949_vm12, %v3104_v10, 920167782 }
  0xf0   : > { %v3165_v1 = vsel %vm741_vm9, %v4225_v19, 1326507024  ;;  %v836_v58 = vshll.u32 %v4217_v12, %v2899_v3  ;;  %v837_v56 = vshrl.u32 %v4212_v54, %v2923_v25  ;;  %v2225_v24 = vmin.u32 %v460_v39, %v3142_v35 }
  0xf1   : > { %vm3169_vm1 = vcmp.le.f32.partialorder %v4226_v62, 0.7853982  ;;  %v369_v22 = vor.u32 4788187, %v368_v0  ;;  %v383_v14 = vadd.s32 3, %v379_v47  ;;  %v450_v28 = vadd.s32 %v3046_v4, %v3043_v8 }
  0xf2   : > { %v553_v41 = vmul.u32 %v546_v53, %v537_v57  ;;  %v462_v45 = vclz %v2225_v24  ;;  %v481_v15 = vsel %vm396_vm0, %v480_v52, %v456_v16  ;;  %vm555_vm2 = vc.u32 %v3145_v2, %v3151_v44 }
  0xf3   : > { %v602_v50 = vand.u32 2147483647, %v2748_v51  ;;  %v370_v63 = vand.u32 2147483647, %v369_v22  ;;  %v372_v31 = vcvt.s32.f32 %v365_v23  ;;  %v556_v30 = vadd.s32 1, %v3152_v17 }
  0xf4   : > { %v619_v47 = vshll.u32 %v4215_v48, %v2865_v21  ;;  %v2226_v13 = vadd.s32 4294967294, %v462_v45  ;;  %v620_v8 = vshrl.u32 %v4213_v61, %v2902_v6  ;;  %v622_v4 = vshll.u32 %v4213_v61, %v2865_v21 }
  0xf5   : > { %v623_v16 = vshrl.u32 %v4216_v36, %v2902_v6  ;;  %v373_v53 = vmul.f32 %v372_v31, %v370_v63  ;;  %v557_v40 = vsel %vm555_vm2, %v556_v30, %v3152_v17  ;;  %v625_v49 = vshll.u32 %v4216_v36, %v2865_v21 }
  0xf6   : > { %v626_v52 = vshrl.u32 %v4217_v12, %v2902_v6  ;;  %vm2227_vm3 = vcmp.lt.s32.totalorder %v2226_v13, 0  ;;  %v558_v39 = vadd.s32 %v557_v40, %v553_v41  ;;  %v609_v57 = vand.u32 8388607, %v602_v50 }
  0xf7   : > { %v621_v19 = vor.u32 %v620_v8, %v619_v47  ;;  %v374_v23 = vxor.u32 2147483648, %v373_v53  ;;  %v465_v0 = vsel %vm2227_vm3, 0, %v2226_v13  ;;  %v624_v62 = vor.u32 %v623_v16, %v622_v4 }
  0xf8   : > { %v627_v24 = vor.u32 %v626_v52, %v625_v49  ;;  %v466_v22 = vsub.s32 32, %v465_v0  ;;  %v470_v45 = vsub.s32 4294967266, %v465_v0  ;;  %v483_v17 = vsel %vm3169_vm1, 0, %v481_v15 }
  0xf9   : > { %v559_v63 = vadd.s32 536870912, %v558_v39  ;;  %v375_v21 = vsel %vm292_vm6, %v374_v23, %v373_v53  ;;  %v467_v31 = vshll.u32 %v3142_v35, %v465_v0  ;;  %vm634_vm4 = vcmp.lt.s32.totalorder %v2889_v60, 1 }
  0xfa   : > { %vm636_vm5 = vcmp.lt.s32.totalorder %v2889_v60, 3  ;;  %vm845_vm7 = vcmp.lt.s32.totalorder %v3107_v5, 4  ;;  %v378_v41 = vsel %vm3095_vm8, %v2731_v27, %v375_v21  ;;  %v468_v30 = vshrl.u32 %v450_v28, %v466_v22 }
  0xfb   : > { %v471_v47 = vadd.s32 127, %v470_v45  ;;  %v560_v13 = vshrl.u32 %v559_v63, 30  ;;  %2495 = vcosq.f32 %v378_v41  ;;  %v610_v15 = vor.u32 8388608, %v609_v57 }
  0xfc   : > { %v642_v8 = vsel %vm634_vm4, %v621_v19, %v624_v62  ;;  %v644_v35 = vsel %vm636_vm5, %v627_v24, %v3021_v29  ;;  %2497 = vsinq.f32 %v378_v41  ;;  %v469_v4 = vor.u32 %v468_v30, %v467_v31 }
  0xfd   : > { %v472_v16 = vshll.u32 %v471_v47, 23  ;;  %v561_v53 = vshll.u32 %v560_v13, 30  ;;  %v3222_v40 = vor.u32 %v837_v56, %v836_v58  ;;  %v3224_v46 = vand.u32 3, %v383_v14  ;;  %v4231_v47 = vld [vmem:[#allocation12_spill] sm:$0xff] }
  0xfe   : > { %v487_v28 = vadd.s32 3, %v483_v17  ;;  %v646_v49 = vsel %vm634_vm4, %v624_v62, %v627_v24  ;;  %vm635_vm6 = vcmp.lt.s32.totalorder %v2889_v60, 2  ;;  %v639_v29 = vsel %vm637_vm15, %v627_v24, 2102212464 }
  0xff   : > { %v473_v52 = vor.u32 4788187, %v472_v16  ;;  %v3228_v57 = vsub.s32 %v558_v39, %v561_v53  ;;  %v618_v23 = vshrl.u32 %v4215_v48, %v2902_v6  ;;  %v645_v58 = vsel %vm635_vm6, %v642_v8, %v644_v35 }
 0x100   : > { %v648_v56 = vsel %vm636_vm5, %v2986_v11, %v3033_v42  ;;  %v650_v14 = vshll.u32 %v610_v15, 8  ;;  %v476_v39 = vcvt.s32.f32 %v469_v4  ;;  %v640_v6 = vsel %vm636_vm5, %v624_v62, %v639_v29  ;;  %v4230_v62 = vld [vmem:[#allocation13_spill] sm:$0xff] }
 0x101   : > { %v474_v0 = vand.u32 2147483647, %v473_v52  ;;  %v564_v22 = vsub.s32 0, %v3228_v57  ;;  %v649_v45 = vsel %vm635_vm6, %v646_v49, %v648_v56  ;;  %v638_v24 = vsel %vm634_vm4, %v618_v23, %v621_v19 }
 0x102   : > { %v3248_v17 = vmul.u32.u64.low %v650_v14, %v649_v45  ;;  %v3249_v63 = vmul.u32.u64.high %v650_v14, %v649_v45, %v3248_v17  ;;  %v3252_v42 = vmul.u32.u64.low %v650_v14, %v645_v58  ;;  %v3253_v31 = vmul.u32.u64.high %v650_v14, %v645_v58, %v3252_v42  ;;  %v4236_v45 = vld [vmem:[#allocation6_spill] sm:$0xff] }
 0x103   : > { %v477_v21 = vmul.f32 %v476_v39, %v474_v0  ;;  %v2229_v11 = vmin.u32 %v564_v22, %v3228_v57  ;;  %v4229_v41 = vor.u32 %v2910_v9, %v2906_v7  ;;  %v3266_v19 = vsel %vm845_vm7, %v3222_v40, 920167782 }
 0x104   : > { %v4232_v15 = vor.u32 %v4230_v62, %v4231_v47  ;;  %vm500_vm15 = vcmp.lt.s32.totalorder %v2753_v55, 0  ;;  %v584_v9 = vsub.s32 4, %v560_v13  ;;  %vm385_vm8 = vcmp.lt.s32.totalorder %v3224_v46, 2 }
 0x105   : > { %v3261_v30 = vsel %vm949_vm12, %v4229_v41, 1326507024  ;;  %v478_v35 = vxor.u32 2147483648, %v477_v21  ;;  %v566_v7 = vclz %v2229_v11  ;;  %v2496_v4 = vpop.eup %2495  ;;  %vm386_vm10 = vcmp.eq.s32.totalorder %v3224_v46, 0 }
 0x106   : > { %v3273_v8 = vsel %vm845_vm7, %v4232_v15, 1326507024  ;;  %vm389_vm11 = vcmp.eq.s32.totalorder %v3224_v46, 2  ;;  %v3279_v16 = vand.u32 3, %v487_v28  ;;  %v641_v53 = vsel %vm635_vm6, %v638_v24, %v640_v6  ;;  %v2498_v49 = vpop.eup %2497 }
 0x107   : > { %v479_v52 = vsel %vm396_vm0, %v478_v35, %v477_v21  ;;  %v554_v29 = vadd.s32 %v3151_v44, %v3145_v2  ;;  %v2230_v23 = vadd.s32 4294967294, %v566_v7  ;;  %vm659_vm13 = vc.u32 %v3249_v63, %v3252_v42 }
 0x108   : > { %v387_v58 = vxor.u32 2147483648, %v2498_v49  ;;  %v390_v56 = vxor.u32 2147483648, %v2496_v4  ;;  %v482_v28 = vsel %vm3169_vm1, %v2738_v34, %v479_v52  ;;  %v4233_v60 = vand.u32 2147483647, %v2753_v55 }
 0x109   : > { %v660_v39 = vadd.s32 1, %v3253_v31  ;;  %vm382_vm0 = vweird.f32 %v2731_v27  ;;  %2499 = vcosq.f32 %v482_v28  ;;  %vm2231_vm2 = vcmp.lt.s32.totalorder %v2230_v23, 0 }
 0x10a   : > { %vm3294_vm14 = vcmp.le.f32.partialorder %v4233_v60, 0.7853982  ;;  %v3302_v2 = vsel %vm500_vm15, %v584_v9, %v560_v13  ;;  %v657_v44 = vmul.u32 %v650_v14, %v641_v53  ;;  %2501 = vsinq.f32 %v482_v28 }
 0x10b   : > { %v569_v38 = vsel %vm2231_vm2, 0, %v2230_v23  ;;  %v661_v22 = vsel %vm659_vm13, %v660_v39, %v3253_v31  ;;  %v706_v24 = vand.u32 2147483647, %v4236_v45  ;;  %v723_v21 = vshll.u32 %v4215_v48, %v2848_v26 }
 0x10c   : > { %v570_v6 = vsub.s32 32, %v569_v38  ;;  %v574_v17 = vsub.s32 4294967266, %v569_v38  ;;  %v724_v11 = vshrl.u32 %v4213_v61, %v2859_v43  ;;  %v388_v41 = vsel %vm386_vm10, %v2496_v4, %v387_v58 }
 0x10d   : > { %v391_v13 = vsel %vm389_vm11, %v390_v56, %v2498_v49  ;;  %v571_v14 = vshll.u32 %v3228_v57, %v569_v38  ;;  %v662_v62 = vadd.s32 %v661_v22, %v657_v44  ;;  %v726_v15 = vshll.u32 %v4213_v61, %v2848_v26 }
 0x10e   : > { %v572_v31 = vshrl.u32 %v554_v29, %v570_v6  ;;  %v575_v47 = vadd.s32 127, %v574_v17  ;;  %v727_v35 = vshrl.u32 %v4216_v36, %v2859_v43  ;;  %vm490_vm1 = vcmp.eq.s32.totalorder %v3279_v16, 0 }
 0x10f   : > { %v663_v7 = vadd.s32 536870912, %v662_v62  ;;  %v713_v9 = vand.u32 8388607, %v706_v24  ;;  %v729_v4 = vshll.u32 %v4216_v36, %v2848_v26  ;;  %v730_v57 = vshrl.u32 %v4217_v12, %v2859_v43 }
 0x110   : > { %v392_v53 = vsel %vm385_vm8, %v388_v41, %v391_v13  ;;  %vm489_vm3 = vcmp.lt.s32.totalorder %v3279_v16, 2  ;;  %v573_v49 = vor.u32 %v572_v31, %v571_v14  ;;  %v576_v52 = vshll.u32 %v575_v47, 23 }
 0x111   : > { %v728_v29 = vor.u32 %v727_v35, %v726_v15  ;;  %vm486_vm4 = vweird.f32 %v2738_v34  ;;  %vm493_vm5 = vcmp.eq.s32.totalorder %v3279_v16, 2  ;;  %v3331_v23 = vshrl.u32 %v663_v7, 30 }
 0x112   : > { %v731_v58 = vor.u32 %v730_v57, %v729_v4  ;;  %vm740_vm6 = vcmp.lt.s32.totalorder %v3057_v59, 3  ;;  %v577_v26 = vor.u32 4788187, %v576_v52  ;;  %v587_v46 = vsel %vm3294_vm14, 0, %v3302_v2  ;;  %v2488_v2 = vld [vmem:[%s4161_s1] sm:$0xff]  }
 0x113   : > { %v725_v56 = vor.u32 %v724_v11, %v723_v21  ;;  %v752_v28 = vsel %vm740_vm6, %v3102_v37, %v3165_v1  ;;  %v393_v60 = vsel %vm382_vm0, nan, %v392_v53  ;;  %v665_v39 = vshll.u32 %v3331_v23, 30  ;;  %v2500_v38 = vpop.eup %2499  ;;  %2298 = vmatpush3.bf16.msra.mxu0 %v2488_v2  ;;  %v2489_v11 = vld [vmem:[%s4161_s1 + $0x8] sm:$0xff]   ;;  %2361 = vmatpush3.bf16.msra.mxu1 %v2488_v2 }
 0x114   : > { %v722_v44 = vshrl.u32 %v4215_v48, %v2859_v43  ;;  %vm738_vm8 = vcmp.lt.s32.totalorder %v3057_v59, 1  ;;  %v578_v22 = vand.u32 2147483647, %v577_v26  ;;  %v580_v6 = vcvt.s32.f32 %v573_v49  ;;  %v2502_v27 = vpop.eup %2501 }
 0x115   : > { %v714_v17 = vor.u32 8388608, %v713_v9  ;;  %v750_v37 = vsel %vm738_vm8, %v728_v29, %v731_v58  ;;  %v494_v1 = vxor.u32 2147483648, %v2500_v38  ;;  %v3352_v21 = vsub.s32 %v662_v62, %v665_v39 }
 0x116   : > { %vm739_vm10 = vcmp.lt.s32.totalorder %v3057_v59, 2  ;;  %v743_v43 = vsel %vm741_vm9, %v731_v58, 2102212464  ;;  %v491_v41 = vxor.u32 2147483648, %v2502_v27  ;;  %v581_v13 = vmul.f32 %v580_v6, %v578_v22  ;;  %v4239_v6 = vld [vmem:[#allocation8_spill] sm:$0xff] }
 0x117   : > { %v746_v14 = vsel %vm738_vm8, %v725_v56, %v728_v29  ;;  %v748_v62 = vsel %vm740_vm6, %v731_v58, %v3158_v32  ;;  %v4237_v31 = vmov 0.0   ;;  %v495_v47 = vsel %vm493_vm5, %v494_v1, %v2502_v27 }
 0x118   : > { %2299 = vmatprep.subr.bf16.mxu0 %v4237_v31  ;;  %2360 = vmatprep.subr.bf16.mxu1 %v4237_v31  ;;  %v668_v15 = vsub.s32 0, %v3352_v21  ;;  %v742_v35 = vsel %vm738_vm8, %v722_v44, %v725_v56  ;;  %v753_v7 = vsel %vm739_vm10, %v750_v37, %v752_v28  ;;  %v492_v9 = vsel %vm490_vm1, %v2500_v38, %v491_v41  ;;  %v4238_v38 = vld [vmem:[#allocation14_spill] sm:$0xff] }
 0x119   : > { %v582_v4 = vxor.u32 2147483648, %v581_v13  ;;  %v744_v32 = vsel %vm740_vm6, %v728_v29, %v743_v43  ;;  %v754_v57 = vshll.u32 %v714_v17, 8  ;;  %v496_v53 = vsel %vm489_vm3, %v492_v9, %v495_v47  ;;  %2300 = vmatpush3.bf16.msra.mxu0 %v2489_v11  ;;  %2362 = vmatpush3.bf16.msra.mxu1 %v2489_v11 }
 0x11a   : > { %v2233_v49 = vmin.u32 %v668_v15, %v3352_v21  ;;  %v688_v52 = vsub.s32 4, %v3331_v23  ;;  %v749_v58 = vsel %vm739_vm10, %v746_v14, %v748_v62  ;;  %v497_v26 = vsel %vm486_vm4, nan, %v496_v53 }
 0x11b   : > { %v583_v56 = vsel %vm500_vm15, %v582_v4, %v581_v13  ;;  %v3388_v29 = vmul.u32.u64.low %v754_v57, %v753_v7  ;;  %v3389_v28 = vmul.u32.u64.high %v754_v57, %v753_v7, %v3388_v29  ;;  %v2466_v16 = vpack.i.bf16 %v497_v26, %v393_v60 }
 0x11c   : > { %v586_v39 = vsel %vm3294_vm14, %v2753_v55, %v583_v56  ;;  %v670_v44 = vclz %v2233_v49  ;;  %v745_v2 = vsel %vm739_vm10, %v742_v35, %v744_v32  ;;  %v3397_v22 = vshrl.u32 %v4238_v38, 5 }
 0x11d   : > { %v591_v34 = vadd.s32 3, %v587_v46  ;;  %vm604_vm9 = vcmp.lt.s32.totalorder %v2748_v51, 0  ;;  %v810_v17 = vand.u32 2147483647, %v4239_v6  ;;  %2467 = vrot.lane.b32.xlu1 %v2466_v16, %s2627_s30  ;;  %2503 = vcosq.f32 %v586_v39 }
 0x11e   : > { %v2234_v60 = vadd.s32 4294967294, %v670_v44  ;;  %v3402_v37 = vmul.u32.u64.low %v754_v57, %v749_v58  ;;  %v3403_v0 = vmul.u32.u64.high %v754_v57, %v749_v58, %v3402_v37  ;;  %2505 = vsinq.f32 %v586_v39 }
 0x11f   : > { %v658_v59 = vadd.s32 %v3252_v42, %v3249_v63  ;;  %v689_v46 = vsel %vm604_vm9, %v688_v52, %v3331_v23  ;;  %v761_v27 = vmul.u32 %v754_v57, %v745_v2  ;;  %v828_v43 = vshrl.u32 %v4213_v61, %v2923_v25 }
 0x120   : > { %vm2235_vm15 = vcmp.lt.s32.totalorder %v2234_v60, 0  ;;  %v3411_v1 = vadd.s32 %v3402_v37, %v3389_v28  ;;  %vm763_vm11 = vc.u32 %v3389_v28, %v3402_v37  ;;  %v817_v41 = vand.u32 8388607, %v810_v17 }
 0x121   : > { %v673_v11 = vsel %vm2235_vm15, 0, %v2234_v60  ;;  %v827_v63 = vshll.u32 %v4215_v48, %v2899_v3  ;;  %v831_v42 = vshrl.u32 %v4216_v36, %v2923_v25  ;;  %v764_v14 = vadd.s32 1, %v3403_v0 }
 0x122   : > { %v674_v23 = vsub.s32 32, %v673_v11  ;;  %v678_v13 = vsub.s32 4294967266, %v673_v11  ;;  %v830_v62 = vshll.u32 %v4213_v61, %v2899_v3  ;;  %v675_v47 = vshll.u32 %v3352_v21, %v673_v11 }
 0x123   : > { %v829_v15 = vor.u32 %v828_v43, %v827_v63  ;;  %v833_v35 = vshll.u32 %v4216_v36, %v2899_v3  ;;  %v834_v7 = vshrl.u32 %v4217_v12, %v2923_v25  ;;  %v765_v32 = vsel %vm763_vm11, %v764_v14, %v3403_v0 }
 0x124   : > { %v676_v9 = vshrl.u32 %v658_v59, %v674_v23  ;;  %v679_v4 = vadd.s32 127, %v678_v13  ;;  %v832_v57 = vor.u32 %v831_v42, %v830_v62  ;;  %v3435_v53 = vshll.u32 %v4217_v12, %v2989_v20 }
 0x125   : > { %vm3439_vm13 = vcmp.le.f32.partialorder %v602_v50, 0.7853982  ;;  %v766_v3 = vadd.s32 %v765_v32, %v761_v27  ;;  %v835_v49 = vor.u32 %v834_v7, %v833_v35  ;;  %v592_v52 = vand.u32 3, %v591_v34 }
 0x126   : > { %v677_v58 = vor.u32 %v676_v9, %v675_v47  ;;  %v680_v26 = vshll.u32 %v679_v4, 23  ;;  %v818_v56 = vor.u32 8388608, %v817_v41  ;;  %v691_v29 = vsel %vm3439_vm13, 0, %v689_v46 }
 0x127   : > { %v767_v28 = vadd.s32 536870912, %v766_v3  ;;  %vm842_vm14 = vcmp.lt.s32.totalorder %v3107_v5, 1  ;;  %vm844_vm0 = vcmp.lt.s32.totalorder %v3107_v5, 3  ;;  %v2504_v16 = vpop.eup %2503  ;;  %v826_v60 = vshrl.u32 %v4215_v48, %v2923_v25 }
 0x128   : > { %v681_v39 = vor.u32 4788187, %v680_v26  ;;  %v850_v50 = vsel %vm842_vm14, %v829_v15, %v832_v57  ;;  %v852_v44 = vsel %vm844_vm0, %v835_v49, %v3266_v19  ;;  %v854_v2 = vsel %vm842_vm14, %v832_v57, %v835_v49  ;;  %v2506_v38 = vpop.eup %2505 }
 0x129   : > { %v3454_v34 = vshrl.u32 %v767_v28, 30  ;;  %vm843_vm2 = vcmp.lt.s32.totalorder %v3107_v5, 2  ;;  %v847_v37 = vsel %vm845_vm7, %v835_v49, 2102212464  ;;  %v684_v59 = vcvt.s32.f32 %v677_v58 }
 0x12a   : > { %v682_v0 = vand.u32 2147483647, %v681_v39  ;;  %v856_v19 = vsel %vm844_vm0, %v3222_v40, %v3273_v8  ;;  %v858_v46 = vshll.u32 %v818_v56, 8  ;;  %v846_v43 = vsel %vm842_vm14, %v826_v60, %v829_v15  ;;  %v4242_v40 = vld [vmem:[#allocation15_spill] sm:$0xff]  ;;  %v4246_v60 = vld [vmem:[#allocation9_spill] sm:$0xff] }
 0x12b   : > { %v769_v27 = vshll.u32 %v3454_v34, 30  ;;  %v853_v25 = vsel %vm843_vm2, %v850_v50, %v852_v44  ;;  %v857_v11 = vsel %vm843_vm2, %v854_v2, %v856_v19  ;;  %v848_v63 = vsel %vm844_vm0, %v832_v57, %v847_v37  ;;  %v4243_v57 = vld [vmem:[#allocation7_spill] sm:$0xff] }
 0x12c   : > { %v685_v41 = vmul.f32 %v684_v59, %v682_v0  ;;  %v3474_v42 = vmul.u32.u64.low %v858_v46, %v857_v11  ;;  %v3475_v23 = vmul.u32.u64.high %v858_v46, %v857_v11, %v3474_v42  ;;  %v3479_v8 = vshrl.u32 %v4212_v54, %v4242_v40  ;;  %v4247_v0 = vld [vmem:[#allocation11_spill] sm:$0xff] }
 0x12d   : > { %v595_v13 = vxor.u32 2147483648, %v2506_v38  ;;  %v598_v14 = vxor.u32 2147483648, %v2504_v16  ;;  %v3481_v62 = vsub.s32 %v766_v3, %v769_v27  ;;  %vm590_vm7 = vweird.f32 %v2753_v55 }
 0x12e   : > { %v686_v47 = vxor.u32 2147483648, %v685_v41  ;;  %v695_v15 = vadd.s32 3, %v691_v29  ;;  %v3484_v35 = vmul.u32.u64.low %v858_v46, %v853_v25  ;;  %v3485_v7 = vmul.u32.u64.high %v858_v46, %v853_v25, %v3484_v35 }
 0x12f   : > { %vm594_vm1 = vcmp.eq.s32.totalorder %v592_v52, 0  ;;  %vm597_vm3 = vcmp.eq.s32.totalorder %v592_v52, 2  ;;  %v772_v9 = vsub.s32 0, %v3481_v62  ;;  %v849_v4 = vsel %vm843_vm2, %v846_v43, %v848_v63 }
 0x130   : > { %v687_v54 = vsel %vm604_vm9, %v686_v47, %v685_v41  ;;  %v3493_v32 = vadd.s32 %v3484_v35, %v3475_v23  ;;  %vm867_vm4 = vc.u32 %v3475_v23, %v3484_v35  ;;  %v914_v3 = vand.u32 2147483647, %v4243_v57 }
 0x131   : > { %v596_v49 = vsel %vm594_vm1, %v2504_v16, %v595_v13  ;;  %v599_v58 = vsel %vm597_vm3, %v598_v14, %v2506_v38  ;;  %v690_v26 = vsel %vm3439_vm13, %v2748_v51, %v687_v54  ;;  %v2237_v56 = vmin.u32 %v772_v9, %v3481_v62 }
 0x132   : > { %vm593_vm5 = vcmp.lt.s32.totalorder %v592_v52, 2  ;;  %2507 = vcosq.f32 %v690_v26  ;;  %v3501_v5 = vand.u32 3, %v695_v15  ;;  %v868_v29 = vadd.s32 1, %v3485_v7 }
 0x133   : > { %2509 = vsinq.f32 %v690_v26  ;;  %v774_v28 = vclz %v2237_v56  ;;  %v792_v39 = vsub.s32 4, %v3454_v34  ;;  %v865_v50 = vmul.u32 %v858_v46, %v849_v4 }
 0x134   : > { %v600_v44 = vsel %vm593_vm5, %v596_v49, %v599_v58  ;;  %vm708_vm6 = vcmp.lt.s32.totalorder %v4236_v45, 0  ;;  %v869_v21 = vsel %vm867_vm4, %v868_v29, %v3485_v7  ;;  %v921_v52 = vand.u32 8388607, %v914_v3 }
 0x135   : > { %vm3513_vm8 = vcmp.le.f32.partialorder %v706_v24, 0.7853982  ;;  %v2238_v2 = vadd.s32 4294967294, %v774_v28  ;;  %v870_v38 = vadd.s32 %v869_v21, %v865_v50  ;;  %v931_v37 = vshll.u32 %v4215_v48, %v4246_v60 }
 0x136   : > { %v932_v59 = vshrl.u32 %v4213_v61, %v4247_v0  ;;  %vm701_vm10 = vcmp.eq.s32.totalorder %v3501_v5, 2  ;;  %v934_v19 = vshll.u32 %v4213_v61, %v4246_v60  ;;  %v935_v46 = vshrl.u32 %v4216_v36, %v4247_v0 }
 0x137   : > { %v937_v24 = vshll.u32 %v4216_v36, %v4246_v60  ;;  %v938_v27 = vshrl.u32 %v4217_v12, %v4247_v0  ;;  %v601_v43 = vsel %vm590_vm7, nan, %v600_v44  ;;  %vm698_vm9 = vcmp.eq.s32.totalorder %v3501_v5, 0 }
 0x138   : > { %vm2239_vm15 = vcmp.lt.s32.totalorder %v2238_v2, 0  ;;  %v793_v25 = vsel %vm708_vm6, %v792_v39, %v3454_v34  ;;  %v871_v11 = vadd.s32 536870912, %v870_v38  ;;  %vm697_vm11 = vcmp.lt.s32.totalorder %v3501_v5, 2 }
 0x139   : > { %v777_v41 = vsel %vm2239_vm15, 0, %v2238_v2  ;;  %v933_v63 = vor.u32 %v932_v59, %v931_v37  ;;  %v936_v42 = vor.u32 %v935_v46, %v934_v19  ;;  %v939_v23 = vor.u32 %v938_v27, %v937_v24 }
 0x13a   : > { %vm694_vm13 = vweird.f32 %v2748_v51  ;;  %v778_v13 = vsub.s32 32, %v777_v41  ;;  %v782_v14 = vsub.s32 4294967266, %v777_v41  ;;  %v3538_v55 = vshrl.u32 %v871_v11, 30 }
 0x13b   : > { %v930_v47 = vshrl.u32 %v4215_v48, %v4247_v0  ;;  %v779_v15 = vshll.u32 %v3481_v62, %v777_v41  ;;  %v922_v35 = vor.u32 8388608, %v921_v52  ;;  %vm946_vm14 = vcmp.lt.s32.totalorder %v3064_v33, 1 }
 0x13c   : > { %vm948_vm0 = vcmp.lt.s32.totalorder %v3064_v33, 3  ;;  %v780_v34 = vshrl.u32 %v3411_v1, %v778_v13  ;;  %v783_v7 = vadd.s32 127, %v782_v14  ;;  %v873_v9 = vshll.u32 %v3538_v55, 30  ;;  %v2508_v54 = vpop.eup %2507 }
 0x13d   : > { %v951_v4 = vsel %vm949_vm12, %v939_v23, 2102212464  ;;  %v954_v49 = vsel %vm946_vm14, %v933_v63, %v936_v42  ;;  %v956_v62 = vsel %vm948_vm0, %v939_v23, %v3176_v18  ;;  %v958_v58 = vsel %vm946_vm14, %v936_v42, %v939_v23  ;;  %v2510_v26 = vpop.eup %2509 }
 0x13e   : > { %v960_v1 = vsel %vm948_vm0, %v3104_v10, %v3261_v30  ;;  %v702_v56 = vxor.u32 2147483648, %v2508_v54  ;;  %v781_v29 = vor.u32 %v780_v34, %v779_v15  ;;  %v784_v28 = vshll.u32 %v783_v7, 23 }
 0x13f   : > { %v3560_v39 = vsub.s32 %v870_v38, %v873_v9  ;;  %v699_v50 = vxor.u32 2147483648, %v2510_v26  ;;  %v795_v44 = vsel %vm3513_vm8, 0, %v793_v25  ;;  %vm947_vm12 = vcmp.lt.s32.totalorder %v3064_v33, 2 }
 0x140   : > { %v950_v18 = vsel %vm946_vm14, %v930_v47, %v933_v63  ;;  %v703_v21 = vsel %vm701_vm10, %v702_v56, %v2510_v26  ;;  %v785_v52 = vor.u32 4788187, %v784_v28  ;;  %v961_v30 = vsel %vm947_vm12, %v958_v58, %v960_v1  ;;  %v4248_v47 = vld [vmem:[#allocation10_spill] sm:$0xff] }
 0x141   : > { %v876_v10 = vsub.s32 0, %v3560_v39  ;;  %v700_v2 = vsel %vm698_vm9, %v2508_v54, %v699_v50  ;;  %v952_v38 = vsel %vm948_vm0, %v936_v42, %v951_v4  ;;  %v957_v60 = vsel %vm947_vm12, %v954_v49, %v956_v62 }
 0x142   : > { %v962_v37 = vshll.u32 %v922_v35, 8  ;;  %v704_v0 = vsel %vm697_vm11, %v700_v2, %v703_v21  ;;  %v786_v59 = vand.u32 2147483647, %v785_v52  ;;  %v788_v19 = vcvt.s32.f32 %v781_v29  ;;  %v4250_v35 = vld [vmem:[#allocation16_spill] sm:$0xff] }
 0x143   : > { %v2241_v46 = vmin.u32 %v876_v10, %v3560_v39  ;;  %v3583_v24 = vor.u32 %v3479_v8, %v3435_v53  ;;  %v705_v27 = vsel %vm694_vm13, nan, %v704_v0  ;;  %v799_v42 = vadd.s32 3, %v795_v44 }
 0x144   : > { %v3587_v25 = vmul.u32.u64.low %v962_v37, %v961_v30  ;;  %v3588_v11 = vmul.u32.u64.high %v962_v37, %v961_v30, %v3587_v25  ;;  %v2471_v41 = vpack.i.bf16 %v705_v27, %v601_v43  ;;  %v789_v63 = vmul.f32 %v788_v19, %v786_v59  ;;  %v4249_v43 = vld [vmem:[#allocation17_spill] sm:$0xff] }
 0x145   : > { %v878_v23 = vclz %v2241_v46  ;;  %v953_v5 = vsel %vm947_vm12, %v950_v18, %v952_v38  ;;  %v3592_v13 = vmul.u32.u64.low %v962_v37, %v957_v60  ;;  %v3593_v14 = vmul.u32.u64.high %v962_v37, %v957_v60, %v3592_v13 }
 0x146   : > { %v1018_v15 = vand.u32 2147483647, %v4248_v47  ;;  %vm1053_vm2 = vcmp.lt.s32.totalorder %v3397_v22, 4  ;;  %2472 = vrot.lane.b32.xlu0 %v2471_v41, %s2627_s30  ;;  %v790_v51 = vxor.u32 2147483648, %v789_v63  ;;  %v4251_v34 = vor.u32 %v4249_v43, %v4250_v35 }
 0x147   : > { %v2242_v53 = vadd.s32 4294967294, %v878_v23  ;;  %v1059_v8 = vsel %vm1053_vm2, %v3583_v24, 920167782  ;;  %v3607_v7 = vadd.s32 %v3592_v13, %v3588_v11  ;;  %vm971_vm7 = vc.u32 %v3588_v11, %v3592_v13 }
 0x148   : > { %v1063_v33 = vsel %vm1053_vm2, %v4251_v34, 1326507024  ;;  %v791_v9 = vsel %vm708_vm6, %v790_v51, %v789_v63  ;;  %v3612_v4 = vand.u32 3, %v799_v42  ;;  %v969_v54 = vmul.u32 %v962_v37, %v953_v5 }
 0x149   : > { %vm2243_vm1 = vcmp.lt.s32.totalorder %v2242_v53, 0  ;;  %v794_v49 = vsel %vm3513_vm8, %v4236_v45, %v791_v9  ;;  %v972_v58 = vadd.s32 1, %v3593_v14  ;;  %v1025_v1 = vand.u32 8388607, %v1018_v15 }
 0x14a   : > { %v881_v62 = vsel %vm2243_vm1, 0, %v2242_v53  ;;  %2511 = vcosq.f32 %v794_v49  ;;  %v1035_v29 = vshll.u32 %v4215_v48, %v2989_v20  ;;  %v1036_v16 = vshrl.u32 %v4213_v61, %v4242_v40 }
 0x14b   : > { %v882_v26 = vsub.s32 32, %v881_v62  ;;  %v886_v56 = vsub.s32 4294967266, %v881_v62  ;;  %2513 = vsinq.f32 %v794_v49  ;;  %v883_v28 = vshll.u32 %v3560_v39, %v881_v62 }
 0x14c   : > { %v973_v50 = vsel %vm971_vm7, %v972_v58, %v3593_v14  ;;  %v1038_v52 = vshll.u32 %v4213_v61, %v2989_v20  ;;  %v1037_v10 = vor.u32 %v1036_v16, %v1035_v29  ;;  %v1039_v30 = vshrl.u32 %v4216_v36, %v4242_v40 }
 0x14d   : > { %v884_v44 = vshrl.u32 %v3493_v32, %v882_v26  ;;  %v887_v18 = vadd.s32 127, %v886_v56  ;;  %v974_v21 = vadd.s32 %v973_v50, %v969_v54  ;;  %v1041_v2 = vshll.u32 %v4216_v36, %v2989_v20 }
 0x14e   : > { %v1042_v39 = vshrl.u32 %v4217_v12, %v4242_v40  ;;  %vm812_vm3 = vcmp.lt.s32.totalorder %v4239_v6, 0  ;;  %vm802_vm4 = vcmp.eq.s32.totalorder %v3612_v4, 0  ;;  %v896_v37 = vsub.s32 4, %v3538_v55 }
 0x14f   : > { %v885_v38 = vor.u32 %v884_v44, %v883_v28  ;;  %v888_v60 = vshll.u32 %v887_v18, 23  ;;  %v975_v32 = vadd.s32 536870912, %v974_v21  ;;  %v1026_v61 = vor.u32 8388608, %v1025_v1 }
 0x150   : > { %v1040_v0 = vor.u32 %v1039_v30, %v1038_v52  ;;  %v1043_v59 = vor.u32 %v1042_v39, %v1041_v2  ;;  %vm801_vm5 = vcmp.lt.s32.totalorder %v3612_v4, 2  ;;  %vm3641_vm6 = vcmp.le.f32.partialorder %v810_v17, 0.7853982 }
 0x151   : > { %v889_v36 = vor.u32 4788187, %v888_v60  ;;  %v3645_v12 = vshrl.u32 %v975_v32, 30  ;;  %vm1050_vm8 = vcmp.lt.s32.totalorder %v3397_v22, 1  ;;  %vm1052_vm10 = vcmp.lt.s32.totalorder %v3397_v22, 3 }
 0x152   : > { %v1034_v19 = vshrl.u32 %v4215_v48, %v4242_v40  ;;  %v1058_v46 = vsel %vm1050_vm8, %v1037_v10, %v1040_v0  ;;  %v1060_v27 = vsel %vm1052_vm10, %v1043_v59, %v1059_v8  ;;  %v1062_v25 = vsel %vm1050_vm8, %v1040_v0, %v1043_v59 }
 0x153   : > { %v890_v11 = vand.u32 2147483647, %v889_v36  ;;  %v892_v17 = vcvt.s32.f32 %v885_v38  ;;  %v977_v41 = vshll.u32 %v3645_v12, 30  ;;  %v1055_v63 = vsel %vm1053_vm2, %v1043_v59, 2102212464 }
 0x154   : > { %vm1051_vm9 = vcmp.lt.s32.totalorder %v3397_v22, 2  ;;  %v1054_v42 = vsel %vm1050_vm8, %v1034_v19, %v1037_v10  ;;  %v1064_v23 = vsel %vm1052_vm10, %v3583_v24, %v1063_v33  ;;  %v1066_v48 = vshll.u32 %v1026_v61, 8  ;;  %v2512_v40 = vpop.eup %2511 }
 0x155   : > { %v893_v5 = vmul.f32 %v892_v17, %v890_v11  ;;  %v978_v13 = vsub.s32 %v974_v21, %v977_v41  ;;  %v1061_v14 = vsel %vm1051_vm9, %v1058_v46, %v1060_v27  ;;  %v1065_v51 = vsel %vm1051_vm9, %v1062_v25, %v1064_v23  ;;  %v2514_v53 = vpop.eup %2513 }
 0x156   : > { %v806_v8 = vxor.u32 2147483648, %v2512_v40  ;;  %v1056_v43 = vsel %vm1052_vm10, %v1040_v0, %v1055_v63  ;;  %v3666_v35 = vmul.u32.u64.low %v1066_v48, %v1065_v51  ;;  %v3667_v34 = vmul.u32.u64.high %v1066_v48, %v1065_v51, %v3666_v35 }
 0x157   : > { %v803_v9 = vxor.u32 2147483648, %v2514_v53  ;;  %vm805_vm15 = vcmp.eq.s32.totalorder %v3612_v4, 2  ;;  %v894_v24 = vxor.u32 2147483648, %v893_v5  ;;  %v980_v33 = vsub.s32 0, %v978_v13 }
 0x158   : > { %v807_v54 = vsel %vm805_vm15, %v806_v8, %v2514_v53  ;;  %v897_v49 = vsel %vm812_vm3, %v896_v37, %v3538_v55  ;;  %v3673_v62 = vmul.u32.u64.low %v1066_v48, %v1061_v14  ;;  %v3674_v58 = vmul.u32.u64.high %v1066_v48, %v1061_v14, %v3673_v62 }
 0x159   : > { %v804_v1 = vsel %vm802_vm4, %v2512_v40, %v803_v9  ;;  %v895_v26 = vsel %vm812_vm3, %v894_v24, %v893_v5  ;;  %v2245_v56 = vmin.u32 %v980_v33, %v978_v13  ;;  %v1057_v29 = vsel %vm1051_vm9, %v1054_v42, %v1056_v43 }
 0x15a   : > { %v808_v28 = vsel %vm801_vm5, %v804_v1, %v807_v54  ;;  %v898_v55 = vsel %vm3641_vm6, %v4239_v6, %v895_v26  ;;  %v3688_v50 = vadd.s32 %v3673_v62, %v3667_v34  ;;  %vm1075_vm11 = vc.u32 %v3667_v34, %v3673_v62 }
 0x15b   : > { %v899_v16 = vsel %vm3641_vm6, 0, %v897_v49  ;;  %2515 = vcosq.f32 %v898_v55  ;;  %v982_v44 = vclz %v2245_v56  ;;  %v1076_v22 = vadd.s32 1, %v3674_v58 }
 0x15c   : > { %2517 = vsinq.f32 %v898_v55  ;;  %v1073_v4 = vmul.u32 %v1066_v48, %v1057_v29  ;;  %v903_v21 = vadd.s32 3, %v899_v16  ;;  %vm2628_vm13 = vmmov 0  }
 0x15d   : > { %v2246_v18 = vadd.s32 4294967294, %v982_v44  ;;  %v1077_v52 = vsel %vm1075_vm11, %v1076_v22, %v3674_v58  ;;  %2301 = vmatprep.mubr.msk.bf16.mxu0 %vm2628_vm13, %v4237_v31  ;;  %2325 = vmatprep.mubr.msk.bf16.mxu1 %vm2628_vm13, %v4237_v31  ;;  %vm798_vm7 = vweird.f32 %v4236_v45  ;;  %vm902_vm1 = vweird.f32 %v4239_v6 }
 0x15e   : > { %v1078_v10 = vadd.s32 %v1077_v52, %v1073_v4  ;;  %v904_v60 = vand.u32 3, %v903_v21  ;;  %v1000_v40 = vsub.s32 4, %v3645_v12  ;;  %v809_v5 = vsel %vm798_vm7, nan, %v808_v28 }
 0x15f   : > { %vm2247_vm14 = vcmp.lt.s32.totalorder %v2246_v18, 0  ;;  %vm916_vm3 = vcmp.lt.s32.totalorder %v4243_v57, 0  ;;  %vm915_vm4 = vcmp.le.f32.partialorder %v914_v3, 0.7853982  ;;  %vm1020_vm9 = vcmp.lt.s32.totalorder %v4248_v47, 0 }
 0x160   : > { %v985_v30 = vsel %vm2247_vm14, 0, %v2246_v18  ;;  %v1079_v38 = vadd.s32 536870912, %v1078_v10  ;;  %vm909_vm0 = vcmp.eq.s32.totalorder %v904_v60, 2  ;;  %vm905_vm12 = vcmp.lt.s32.totalorder %v904_v60, 2 }
 0x161   : > { %v986_v2 = vsub.s32 32, %v985_v30  ;;  %v990_v39 = vsub.s32 4294967266, %v985_v30  ;;  %v987_v32 = vshll.u32 %v978_v13, %v985_v30  ;;  %vm906_vm2 = vcmp.eq.s32.totalorder %v904_v60, 0 }
 0x162   : > { %v3700_v0 = vshrl.u32 %v1079_v38, 30  ;;  %v1001_v6 = vsel %vm916_vm3, %v1000_v40, %v3645_v12  ;;  %vm1019_vm15 = vcmp.le.f32.partialorder %v1018_v15, 0.7853982  ;;  %vm1158_vm7 = vcmask 130048   ;;  %v2547_v40 = vld [vmem:[%s2704_s25 + $0x18] sm:$0xff] }
 0x163   : > { %v988_v37 = vshrl.u32 %v3607_v7, %v986_v2  ;;  %v991_v61 = vadd.s32 127, %v990_v39  ;;  %v1003_v9 = vsel %vm915_vm4, 0, %v1001_v6  ;;  %v156_v6 = vld [vmem:[%s2704_s25 + $0x68] sm:$0xff] }
 0x164   : > { %v1081_v19 = vshll.u32 %v3700_v0, 30  ;;  %v1007_v49 = vadd.s32 3, %v1003_v9  ;;  %v1104_v4 = vsub.s32 4, %v3700_v0  ;;  %v2550_v9 = vld [vmem:[%s2704_s25 + $0x20] sm:$0xff] }
 0x165   : > { %v2516_v59 = vpop.eup %2515  ;;  %v989_v20 = vor.u32 %v988_v37, %v987_v32  ;;  %v992_v36 = vshll.u32 %v991_v61, 23 }
 0x166   : > { %v2518_v46 = vpop.eup %2517  ;;  %v910_v27 = vxor.u32 2147483648, %v2516_v59  ;;  %v1082_v17 = vsub.s32 %v1078_v10, %v1081_v19  ;;  %v1008_v26 = vand.u32 3, %v1007_v49  ;;  %v1105_v2 = vsel %vm1020_vm9, %v1104_v4, %v3700_v0  ;;  %v2551_v4 = vld [vmem:[%s2704_s25 + $0x38] sm:$0xff] }
 0x167   : > { %v907_v25 = vxor.u32 2147483648, %v2518_v46  ;;  %v993_v11 = vor.u32 4788187, %v992_v36  ;;  %v996_v7 = vcvt.s32.f32 %v989_v20  ;;  %v1107_v38 = vsel %vm1019_vm15, 0, %v1105_v2  ;;  %v152_v2 = vld [vmem:[%s2704_s25 + $0x48] sm:$0xff] }
 0x168   : > { %v911_v41 = vsel %vm909_vm0, %v910_v27, %v2518_v46  ;;  %v1084_v23 = vsub.s32 0, %v1082_v17  ;;  %vm1013_vm6 = vcmp.eq.s32.totalorder %v1008_v26, 2  ;;  %vm1010_vm8 = vcmp.eq.s32.totalorder %v1008_v26, 0 }
 0x169   : > { %v908_v63 = vsel %vm906_vm2, %v2516_v59, %v907_v25  ;;  %v994_v42 = vand.u32 2147483647, %v993_v11  ;;  %vm1009_vm10 = vcmp.lt.s32.totalorder %v1008_v26, 2  ;;  %v1111_v60 = vadd.s32 3, %v1107_v38 }
 0x16a   : > { %v912_v48 = vsel %vm905_vm12, %v908_v63, %v911_v41  ;;  %v2249_v51 = vmin.u32 %v1084_v23, %v1082_v17  ;;  %vm1006_vm12 = vweird.f32 %v4243_v57  ;;  %vm1110_vm2 = vweird.f32 %v4248_v47  ;;  %v2545_v41 = vld [vmem:[%s2704_s25 + $0x8] sm:$0xff] }
 0x16b   : > { %v913_v13 = vsel %vm902_vm1, nan, %v912_v48  ;;  %v997_v14 = vmul.f32 %v996_v7, %v994_v42  ;;  %v1112_v32 = vand.u32 3, %v1111_v60  ;;  %v2546_v42 = vld [vmem:[%s2704_s25] sm:$0xff]  ;;  %vm1201_vm1 = vcmask 261120  }
 0x16c   : > { %v2476_v53 = vpack.i.bf16 %v913_v13, %v809_v5  ;;  %v1086_v43 = vclz %v2249_v51  ;;  %v2548_v13 = vld [vmem:[%s2704_s25 + $0x10] sm:$0xff] }
 0x16d   : > { %v998_v8 = vxor.u32 2147483648, %v997_v14  ;;  %vm1117_vm11 = vcmp.eq.s32.totalorder %v1112_v32, 2  ;;  %vm1114_vm14 = vcmp.eq.s32.totalorder %v1112_v32, 0  ;;  %vm1113_vm0 = vcmp.lt.s32.totalorder %v1112_v32, 2  ;;  %v153_v32 = vld [vmem:[%s2704_s25 + $0x50] sm:$0xff] }
 0x16e   : > { %2477 = vrot.lane.b32.xlu1 %v2476_v53, %s2627_s30  ;;  %v2250_v35 = vadd.s32 4294967294, %v1086_v43 }
 0x16f   : > { %v999_v45 = vsel %vm916_vm3, %v998_v8, %v997_v14 }
 0x170   : > { %v1002_v34 = vsel %vm915_vm4, %v4243_v57, %v999_v45  ;;  %vm2251_vm5 = vcmp.lt.s32.totalorder %v2250_v35, 0  ;;  %v155_v45 = vld [vmem:[%s2704_s25 + $0x60] sm:$0xff]  ;;  %vm1378_vm4 = vcmask 392192  }
 0x171   : > { %2519 = vcosq.f32 %v1002_v34  ;;  %v1089_v24 = vsel %vm2251_vm5, 0, %v2250_v35  ;;  %v2549_v35 = vld [vmem:[%s2704_s25 + $0x28] sm:$0xff]  ;;  %vm1683_vm5 = vcmask 1042434  }
 0x172   : > { %2521 = vsinq.f32 %v1002_v34  ;;  %1147 = vrot.lane.b32.xlu1 %v4237_v31, %s2627_s30  ;;  %v1090_v33 = vsub.s32 32, %v1089_v24  ;;  %v1094_v54 = vsub.s32 4294967266, %v1089_v24  ;;  %v1091_v62 = vshll.u32 %v1082_v17, %v1089_v24 }
 0x174   : > { %v1092_v3 = vshrl.u32 %v3688_v50, %v1090_v33  ;;  %v1095_v58 = vadd.s32 127, %v1094_v54 }
 0x176   : > { %v1093_v1 = vor.u32 %v1092_v3, %v1091_v62  ;;  %v1096_v12 = vshll.u32 %v1095_v58, 23  ;;  %v157_v58 = vld [vmem:[%s2704_s25 + $0x70] sm:$0xff] }
 0x178   : > { %v1097_v56 = vor.u32 4788187, %v1096_v12  ;;  %v1100_v55 = vcvt.s32.f32 %v1093_v1  ;;  %v158_v1 = vld [vmem:[%s2704_s25 + $0x78] sm:$0xff] }
 0x17a   : > { %v1098_v28 = vand.u32 2147483647, %v1097_v56 }
 0x17b   : > { %v2520_v29 = vpop.eup %2519 }
 0x17c   : > { %v2522_v16 = vpop.eup %2521  ;;  %v1014_v44 = vxor.u32 2147483648, %v2520_v29  ;;  %v1101_v18 = vmul.f32 %v1100_v55, %v1098_v28  ;;  %v2490_v28 = vld [vmem:[%s4161_s1 + $0x10] sm:$0xff]  }
 0x17d   : > { %v1011_v22 = vxor.u32 2147483648, %v2522_v16  ;;  %2337 = vmatprep.subr.bf16.mxu1 %v2490_v28 }
 0x17e   : > { %v1015_v21 = vsel %vm1013_vm6, %v1014_v44, %v2522_v16  ;;  %v1102_v50 = vxor.u32 2147483648, %v1101_v18  ;;  %vm1685_vm6 = vcmask 1043459  }
 0x17f   : > { %v1012_v52 = vsel %vm1010_vm8, %v2520_v29, %v1011_v22  ;;  %v159_v29 = vld [vmem:[%s2704_s25 + $0x80] sm:$0xff]  ;;  %vm1687_vm8 = vcmask 1044484  }
 0x180   : > { %v1016_v10 = vsel %vm1009_vm10, %v1012_v52, %v1015_v21  ;;  %v1103_v30 = vsel %vm1020_vm9, %v1102_v50, %v1101_v18  ;;  %v2552_v52 = vld [vmem:[%s2704_s25 + $0x30] sm:$0xff]  ;;  %vm1689_vm10 = vcmask 1045509   ;;  %vm1691_vm9 = vcmask 1046534  }
 0x181   : > { %v1106_v39 = vsel %vm1019_vm15, %v4248_v47, %v1103_v30  ;;  %v1017_v46 = vsel %vm1006_vm12, nan, %v1016_v10  ;;  %v151_v30 = vld [vmem:[%s2704_s25 + $0x40] sm:$0xff]  ;;  %vm1693_vm15 = vcmask 1047559  }
 0x182   : > { %2523 = vcosq.f32 %v1106_v39 }
 0x183   : > { %2525 = vsinq.f32 %v1106_v39 }
 0x18c   : > { %v2524_v37 = vpop.eup %2523 }
 0x18d   : > { %v2526_v61 = vpop.eup %2525  ;;  %v1118_v59 = vxor.u32 2147483648, %v2524_v37 }
 0x18e   : > { %v1115_v20 = vxor.u32 2147483648, %v2526_v61 }
 0x18f   : > { %v1119_v36 = vsel %vm1117_vm11, %v1118_v59, %v2526_v61  ;;  %v2468_v19 = vpop.permute.xlu1 %2467 }
 0x190   : > { %v1116_v15 = vsel %vm1114_vm14, %v2524_v37, %v1115_v20  ;;  %v2470_v25 = vunpack.i.h.bf16 %v2468_v19  ;;  %v2469_v11 = vunpack.i.l.bf16 %v2468_v19  ;;  %v154_v37 = vld [vmem:[%s2704_s25 + $0x58] sm:$0xff] }
 0x191   : > { %v1120_v0 = vsel %vm1113_vm0, %v1116_v15, %v1119_v36  ;;  %v2491_v36 = vld [vmem:[%s4161_s1 + $0x18] sm:$0xff]   ;;  %v2492_v15 = vld [vmem:[%s4161_s1 + $0x20] sm:$0xff]  }
 0x192   : > { %v1121_v27 = vsel %vm1110_vm2, nan, %v1120_v0  ;;  %v1160_v63 = vsel %vm1158_vm7, %v2545_v41, %v2470_v25  ;;  %v1159_v7 = vsel %vm1158_vm7, %v2546_v42, %v2469_v11  ;;  %v4254_v0 = vlaneseq }
 0x193   : > { %v2481_v17 = vpack.i.bf16 %v1121_v27, %v1017_v46  ;;  %v1176_v57 = vpack.c.bf16 %v1160_v63, %v1159_v7  ;;  %v3797_v46 = vld [vmem:[%s4161_s1 + $0x38] sm:$0x1] }
 0x194   : > { %v3792_v19 = vshrl.u32 %v4254_v0, 7  ;;  %v175_v27 = vunpack.c.l.bf16 %v3797_v46 }
 0x195   : > { %2482 = vrot.lane.b32.xlu0 %v2481_v17, %s2627_s30  ;;  %2302 = vmatmul.mubr.msk.bf16.vlgmr.msra.gmra.mrb[0].mxu0 %vm1201_vm1, %v1176_v57 }
 0x196   : > { %2305 = vmatprep.mubr.msk.bf16.mxu0 %vm2628_vm13, %v4237_v31  ;;  %v3801_v25 = vsub.s32 0, %v3792_v19 }
 0x198   : > { %v3806_v11 = vrot.slane %v175_v27, %v3801_v25 }
 0x1b8   : > { %v2473_v47 = vpop.permute.xlu0 %2472 }
 0x1b9   : > { %v2475_v23 = vunpack.i.h.bf16 %v2473_v47  ;;  %v2474_v48 = vunpack.i.l.bf16 %v2473_v47 }
 0x1bb   : > { %v1162_v5 = vsel %vm1158_vm7, %v2547_v40, %v2475_v23  ;;  %v1161_v14 = vsel %vm1158_vm7, %v2548_v13, %v2474_v48  ;;  %v4255_v23 = vld [vmem:[#allocation5_spill] sm:$0xff] }
 0x1bc   : > { %v1177_v51 = vpack.c.bf16 %v1162_v5, %v1161_v14  ;;  %vm1333_vm3 = vcmp.ge.s32.totalorder %v4255_v23, 32 }
 0x1be   : > { %2306 = vmatmul.mubr.msk.bf16.gmra.mrb[4].mxu0 %vm1201_vm1, %v1177_v51 }
 0x1bf   : > { %2309 = vmatprep.mubr.msk.bf16.mxu0 %vm2628_vm13, %v4237_v31 }
 0x1e0   : > { %v2478_v53 = vpop.permute.xlu1 %2477 }
 0x1e1   : > { %v2480_v8 = vunpack.i.h.bf16 %v2478_v53  ;;  %v2479_v43 = vunpack.i.l.bf16 %v2478_v53 }
 0x1e3   : > { %v1164_v34 = vsel %vm1158_vm7, %v2549_v35, %v2480_v8  ;;  %v1163_v24 = vsel %vm1158_vm7, %v2550_v9, %v2479_v43 }
 0x1e4   : > { %v1178_v33 = vpack.c.bf16 %v1164_v34, %v1163_v24  ;;  %v1148_v54 = vpop.permute.xlu1 %1147 }
 0x1e5   : > { %v1171_v49 = vsel %vm1158_vm7, %v155_v45, %v1148_v54  ;;  %v1172_v62 = vsel %vm1158_vm7, %v156_v6, %v1148_v54  ;;  %v1173_v12 = vsel %vm1158_vm7, %v157_v58, %v1148_v54  ;;  %v1174_v26 = vsel %vm1158_vm7, %v158_v1, %v1148_v54 }
 0x1e6   : > { %2310 = vmatmul.mubr.msk.bf16.gmra.mrb[8].mxu0 %vm1201_vm1, %v1178_v33  ;;  %v1182_v3 = vpack.c.bf16 %v1172_v62, %v1171_v49  ;;  %v1183_v56 = vpack.c.bf16 %v1174_v26, %v1173_v12  ;;  %v1175_v55 = vsel %vm1158_vm7, %v159_v29, %v1148_v54  ;;  %v1167_v39 = vsel %vm1158_vm7, %v151_v30, %v1148_v54 }
 0x1e7   : > { %2313 = vmatprep.mubr.msk.bf16.mxu0 %vm2628_vm13, %v4237_v31  ;;  %v1184_v16 = vpack.c.bf16 %v1175_v55, %v1175_v55  ;;  %v1168_v38 = vsel %vm1158_vm7, %v152_v2, %v1148_v54  ;;  %v1169_v61 = vsel %vm1158_vm7, %v153_v32, %v1148_v54  ;;  %v1170_v59 = vsel %vm1158_vm7, %v154_v37, %v1148_v54 }
 0x1e8   : > { %2326 = vmatmul.mubr.msk.bf16.vlgmr.msra.gmra.mrb[0].mxu1 %vm1201_vm1, %v1182_v3  ;;  %v1180_v60 = vpack.c.bf16 %v1168_v38, %v1167_v39  ;;  %v1181_v20 = vpack.c.bf16 %v1170_v59, %v1169_v61 }
 0x1e9   : > { %2329 = vmatprep.mubr.msk.bf16.mxu1 %vm2628_vm13, %v4237_v31  ;;  %2338 = vmatpush3.bf16.msra.mxu1 %v2490_v28 }
 0x1ea   : > { %2339 = vmatprep.subr.bf16.mxu1 %v2491_v36 }
 0x1ed   : > { %2340 = vmatpush3.bf16.msra.mxu1 %v2491_v36 }
 0x1ee   : > { %2341 = vmatprep.subr.bf16.mxu1 %v2492_v15 }
 0x1f0   : > { %2330 = vmatmul.mubr.msk.bf16.gmra.mrb[4].mxu1 %vm1201_vm1, %v1183_v56 }
 0x1f1   : > { %2333 = vmatprep.mubr.msk.bf16.mxu1 %vm2628_vm13, %v4237_v31  ;;  %2342 = vmatpush3.bf16.msra.mxu1 %v2492_v15 }
 0x1f2   : > { %2351 = vmatprep.subr.bf16.mxu1 %v4237_v31 }
 0x1f8   : > { %2334 = vmatmul.mubr.msk.bf16.gmra.mrb[8].mxu1 %vm1201_vm1, %v1184_v16 }
 0x207   : > { %v2483_v44 = vpop.permute.xlu0 %2482 }
 0x208   : > { %v2485_v22 = vunpack.i.h.bf16 %v2483_v44  ;;  %v2484_v18 = vunpack.i.l.bf16 %v2483_v44 }
 0x20a   : > { %v1166_v21 = vsel %vm1158_vm7, %v2551_v4, %v2485_v22  ;;  %v1165_v50 = vsel %vm1158_vm7, %v2552_v52, %v2484_v18 }
 0x20b   : > { %v1179_v10 = vpack.c.bf16 %v1166_v21, %v1165_v50 }
 0x20d   : > { %2314 = vmatmul.mubr.msk.bf16.gmra.mrb[12].mxu0 %vm1201_vm1, %v1179_v10 }
 0x20e   : > { %2317 = vmatprep.mubr.msk.bf16.mxu0 %vm2628_vm13, %v4237_v31 }
 0x215   : > { %2318 = vmatmul.mubr.msk.bf16.gmra.mrb[16].mxu0 %vm1201_vm1, %v1180_v60 }
 0x216   : > { %2321 = vmatprep.mubr.msk.bf16.mxu0 %vm2628_vm13, %v4237_v31 }
 0x21d   : > { %2322 = vmatmul.mubr.msk.bf16.gmra.mrb[20].mxu0 %vm1201_vm1, %v1181_v20 }
 0x268   : > { %v1263_v17 = vpop.f32.mrb[0].mxu0 }
 0x269   : > { %v3809_v41 = vadd.f32 %v1263_v17, %v3806_v11  ;;  %v2303_v63 = vpop.f32.mrb[1].mxu0 }
 0x26a   : > { %v1266_v42 = vpop.f32.mrb[2].mxu0 }
 0x26b   : > { %v1334_v7 = vmax.f32 %v3809_v41, 0.0  ;;  %v3813_v57 = vadd.f32 %v1266_v42, %v3806_v11  ;;  %v2304_v47 = vpop.f32.mrb[3].mxu0 }
 0x26d   : > { %v1335_v48 = vmax.f32 %v3813_v57, 0.0  ;;  %v1344_v40 = vsel %vm1333_vm3, %v1334_v7, %v3809_v41 }
 0x26f   : > { %v1345_v5 = vsel %vm1333_vm3, %v1335_v48, %v3813_v57 }
 0x270   : > { %v1352_v13 = vpack.c.bf16 %v1345_v5, %v1344_v40  ;;  %v3890_v5 = vsub.s32 1, %v3792_v19 }
 0x272   : > { %2343 = vmatprep.mubr.msk.bf16.mxu1 %vm1378_vm4, %v1352_v13  ;;  %v1359_v13 = vrot.slane %v175_v27, %v3890_v5 }
 0x291   : > { %v1271_v14 = vpop.f32.mrb[4].mxu0 }
 0x292   : > { %v3825_v51 = vadd.f32 %v1271_v14, %v3806_v11  ;;  %v2307_v53 = vpop.f32.mrb[5].mxu0 }
 0x293   : > { %v1274_v8 = vpop.f32.mrb[6].mxu0 }
 0x294   : > { %v1336_v43 = vmax.f32 %v3825_v51, 0.0  ;;  %v3829_v45 = vadd.f32 %v1274_v8, %v3806_v11  ;;  %v2308_v6 = vpop.f32.mrb[7].mxu0 }
 0x296   : > { %v1337_v35 = vmax.f32 %v3829_v45, 0.0  ;;  %v1346_v34 = vsel %vm1333_vm3, %v1336_v43, %v3825_v51 }
 0x298   : > { %v1347_v9 = vsel %vm1333_vm3, %v1337_v35, %v3829_v45 }
 0x299   : > { %v1353_v24 = vpack.c.bf16 %v1347_v9, %v1346_v34 }
 0x29b   : > { %2344 = vmatmul.mubr.msk.bf16.vlgmr.msra.gmra.mrb[12].mxu1 %vm1378_vm4, %v1353_v24 }
 0x2b9   : > { %v1279_v33 = vpop.f32.mrb[8].mxu0 }
 0x2ba   : > { %v3840_v54 = vadd.f32 %v1279_v33, %v3806_v11  ;;  %v2311_v49 = vpop.f32.mrb[9].mxu0 }
 0x2bb   : > { %v1282_v62 = vpop.f32.mrb[10].mxu0  ;;  %v3842_v3 = vpop.f32.mrb[0].mxu1 }
 0x2bc   : > { %v1338_v58 = vmax.f32 %v3840_v54, 0.0  ;;  %v3846_v1 = vadd.f32 %v1282_v62, %v3806_v11  ;;  %v2312_v12 = vpop.f32.mrb[11].mxu0  ;;  %v2327_v26 = vpop.f32.mrb[1].mxu1 }
 0x2bd   : > { %v3848_v56 = vpop.f32.mrb[2].mxu1 }
 0x2be   : > { %v1339_v29 = vmax.f32 %v3846_v1, 0.0  ;;  %v2328_v28 = vpop.f32.mrb[3].mxu1  ;;  %v1348_v55 = vsel %vm1333_vm3, %v1338_v58, %v3840_v54 }
 0x2c0   : > { %v1349_v16 = vsel %vm1333_vm3, %v1339_v29, %v3846_v1 }
 0x2c1   : > { %v1354_v44 = vpack.c.bf16 %v1349_v16, %v1348_v55 }
 0x2c3   : > { %2347 = vmatprep.mubr.msk.bf16.mxu1 %vm1378_vm4, %v1354_v44  ;;  %v3858_v22 = vpop.f32.mrb[4].mxu1 }
 0x2c4   : > { %v2331_v18 = vpop.f32.mrb[5].mxu1 }
 0x2c5   : > { %v3860_v4 = vpop.f32.mrb[6].mxu1 }
 0x2c6   : > { %v2332_v21 = vpop.f32.mrb[7].mxu1 }
 0x2cb   : > { %v3862_v52 = vpop.f32.mrb[8].mxu1 }
 0x2cc   : > { %v2335_v50 = vpop.f32.mrb[9].mxu1 }
 0x2cd   : > { %v1330_v10 = vpop.f32.mrb[10].mxu1 }
 0x2ce   : > { %v2336_v30 = vpop.f32.mrb[11].mxu1 }
 0x2e0   : > { %v1287_v2 = vpop.f32.mrb[12].mxu0 }
 0x2e1   : > { %v3865_v39 = vadd.f32 %v1287_v2, %v3806_v11  ;;  %v2315_v38 = vpop.f32.mrb[13].mxu0 }
 0x2e2   : > { %v1290_v60 = vpop.f32.mrb[14].mxu0 }
 0x2e3   : > { %v1340_v32 = vmax.f32 %v3865_v39, 0.0  ;;  %v3869_v37 = vadd.f32 %v1290_v60, %v3806_v11  ;;  %v2316_v61 = vpop.f32.mrb[15].mxu0 }
 0x2e5   : > { %v1341_v59 = vmax.f32 %v3869_v37, 0.0  ;;  %v1350_v20 = vsel %vm1333_vm3, %v1340_v32, %v3865_v39 }
 0x2e7   : > { %v1351_v36 = vsel %vm1333_vm3, %v1341_v59, %v3869_v37 }
 0x2e8   : > { %v1355_v15 = vpack.c.bf16 %v1351_v36, %v1350_v20  ;;  %v3878_v0 = vpop.f32.mrb[16].mxu0 }
 0x2e9   : > { %v2319_v17 = vpop.f32.mrb[17].mxu0 }
 0x2ea   : > { %2348 = vmatmul.mubr.msk.bf16.gmra.mrb[16].mxu1 %vm1378_vm4, %v1355_v15  ;;  %v3881_v63 = vpop.f32.mrb[18].mxu0 }
 0x2eb   : > { %v2320_v42 = vpop.f32.mrb[19].mxu0  ;;  %2355 = vmatprep.mubr.msk.bf16.mxu1 %vm2628_vm13, %v4237_v31  ;;  %vm1681_vm13 = vcmask 1041409  }
 0x2f0   : > { %v3885_v7 = vpop.f32.mrb[20].mxu0 }
 0x2f1   : > { %v2323_v47 = vpop.f32.mrb[21].mxu0 }
 0x2f2   : > { %v3887_v48 = vpop.f32.mrb[22].mxu0 }
 0x2f3   : > { %v2324_v40 = vpop.f32.mrb[23].mxu0 }
 0x36e   : > { %v2345_v14 = vpop.f32.mrb[12].mxu1 }
 0x36f   : > { %v3895_v53 = vadd.f32 %v2345_v14, %v1359_v13  ;;  %v1425_v8 = vpop.f32.mrb[13].mxu1 }
 0x370   : > { %v3897_v43 = vadd.f32 %v1425_v8, %v1359_v13  ;;  %v2346_v6 = vpop.f32.mrb[14].mxu1 }
 0x371   : > { %v1470_v35 = vsel %vm1201_vm1, %v3895_v53, 0.0  ;;  %v3901_v34 = vadd.f32 %v2346_v6, %v1359_v13  ;;  %v1428_v9 = vpop.f32.mrb[15].mxu1 }
 0x372   : > { %v1471_v24 = vrot.slane %v1470_v35, 4  ;;  %v1456_v33 = vsel %vm1201_vm1, %v3897_v43, 0.0  ;;  %v3905_v49 = vadd.f32 %v1428_v9, %v1359_v13 }
 0x373   : > { %v1457_v46 = vrot.slane %v1456_v33, 4  ;;  %v1477_v27 = vsel %vm1201_vm1, %v3901_v34, 0.0 }
 0x374   : > { %v1472_v62 = vadd.f32 %v1471_v24, %v1470_v35  ;;  %v1478_v58 = vrot.slane %v1477_v27, 4  ;;  %v1463_v12 = vsel %vm1201_vm1, %v3905_v49, 0.0 }
 0x375   : > { %v1458_v26 = vadd.f32 %v1457_v46, %v1456_v33  ;;  %v1464_v29 = vrot.slane %v1463_v12, 4 }
 0x376   : > { %v1473_v28 = vrot.slane %v1472_v62, 2  ;;  %v1479_v55 = vadd.f32 %v1478_v58, %v1477_v27 }
 0x377   : > { %v1459_v16 = vrot.slane %v1458_v26, 2  ;;  %v1465_v44 = vadd.f32 %v1464_v29, %v1463_v12 }
 0x378   : > { %v1474_v18 = vadd.f32 %v1473_v28, %v1472_v62  ;;  %v1480_v21 = vrot.slane %v1479_v55, 2 }
 0x379   : > { %v1460_v50 = vadd.f32 %v1459_v16, %v1458_v26  ;;  %v1466_v10 = vrot.slane %v1465_v44, 2 }
 0x37a   : > { %v1481_v30 = vadd.f32 %v1480_v21, %v1479_v55  ;;  %v1475_v2 = vrot.slane %v1474_v18, 1 }
 0x37b   : > { %v1467_v38 = vadd.f32 %v1466_v10, %v1465_v44  ;;  %v1461_v60 = vrot.slane %v1460_v50, 1 }
 0x37c   : > { %v1476_v32 = vadd.f32 %v1475_v2, %v1474_v18  ;;  %v1482_v61 = vrot.slane %v1481_v30, 1 }
 0x37d   : > { %v1462_v59 = vadd.f32 %v1461_v60, %v1460_v50  ;;  %v1468_v20 = vrot.slane %v1467_v38, 1 }
 0x37e   : > { %v1515_v36 = vmul.f32 0.125, %v1476_v32  ;;  %v1483_v15 = vadd.f32 %v1482_v61, %v1481_v30 }
 0x37f   : > { %v1469_v17 = vadd.f32 %v1468_v20, %v1467_v38  ;;  %v1513_v47 = vmul.f32 0.125, %v1462_v59 }
 0x380   : > { %1533 = vrot.lane.b32.xlu0 %v1515_v36, %s2629_s17  ;;  %v1516_v42 = vmul.f32 0.125, %v1483_v15 }
 0x381   : > { %v1514_v40 = vmul.f32 0.125, %v1469_v17 }
 0x382   : > { %1535 = vrot.lane.b32.xlu1 %v1516_v42, %s2629_s17 }
 0x383   : > { %v2085_v14 = vsel %vm1681_vm13, %v1514_v40, %v1513_v47 }
 0x384   : > { %1529 = vrot.lane.b32.xlu0 %v1513_v47, %s2629_s17  ;;  %v2086_v8 = vsel %vm1683_vm5, %v1515_v36, %v2085_v14 }
 0x385   : > { %v2087_v6 = vsel %vm1685_vm6, %v1516_v42, %v2086_v8 }
 0x386   : > { %1531 = vrot.lane.b32.xlu1 %v1514_v40, %s2629_s17 }
 0x3bd   : > { %v2349_v35 = vpop.f32.mrb[16].mxu1 }
 0x3be   : > { %v3918_v9 = vadd.f32 %v2349_v35, %v1359_v13  ;;  %v1441_v24 = vpop.f32.mrb[17].mxu1 }
 0x3bf   : > { %v3920_v33 = vadd.f32 %v1441_v24, %v1359_v13  ;;  %v2350_v46 = vpop.f32.mrb[18].mxu1 }
 0x3c0   : > { %v1498_v27 = vsel %vm1201_vm1, %v3918_v9, 0.0  ;;  %v3924_v62 = vadd.f32 %v2350_v46, %v1359_v13  ;;  %v1444_v58 = vpop.f32.mrb[19].mxu1 }
 0x3c1   : > { %v1499_v12 = vrot.slane %v1498_v27, 4  ;;  %v1484_v26 = vsel %vm1201_vm1, %v3920_v33, 0.0  ;;  %v1445_v29 = vadd.f32 %v1444_v58, %v1359_v13 }
 0x3c2   : > { %v1485_v28 = vrot.slane %v1484_v26, 4  ;;  %v1505_v55 = vsel %vm1201_vm1, %v3924_v62, 0.0 }
 0x3c3   : > { %v1500_v16 = vadd.f32 %v1499_v12, %v1498_v27  ;;  %v1506_v44 = vrot.slane %v1505_v55, 4  ;;  %v1491_v18 = vsel %vm1201_vm1, %v1445_v29, 0.0 }
 0x3c4   : > { %v1486_v21 = vadd.f32 %v1485_v28, %v1484_v26  ;;  %v1492_v50 = vrot.slane %v1491_v18, 4 }
 0x3c5   : > { %v1501_v10 = vrot.slane %v1500_v16, 2  ;;  %v1507_v30 = vadd.f32 %v1506_v44, %v1505_v55 }
 0x3c6   : > { %v1487_v2 = vrot.slane %v1486_v21, 2  ;;  %v1493_v38 = vadd.f32 %v1492_v50, %v1491_v18 }
 0x3c7   : > { %v1502_v60 = vadd.f32 %v1501_v10, %v1500_v16  ;;  %v1508_v32 = vrot.slane %v1507_v30, 2 }
 0x3c8   : > { %v1488_v61 = vadd.f32 %v1487_v2, %v1486_v21  ;;  %v1494_v59 = vrot.slane %v1493_v38, 2 }
 0x3c9   : > { %v1509_v20 = vadd.f32 %v1508_v32, %v1507_v30  ;;  %v1503_v13 = vrot.slane %v1502_v60, 1 }
 0x3ca   : > { %v1495_v36 = vadd.f32 %v1494_v59, %v1493_v38  ;;  %v1489_v15 = vrot.slane %v1488_v61, 1 }
 0x3cb   : > { %v1510_v17 = vrot.slane %v1509_v20, 1  ;;  %v1504_v40 = vadd.f32 %v1503_v13, %v1502_v60 }
 0x3cc   : > { %v1490_v42 = vadd.f32 %v1489_v15, %v1488_v61  ;;  %v1496_v47 = vrot.slane %v1495_v36, 1 }
 0x3cd   : > { %v1511_v35 = vadd.f32 %v1510_v17, %v1509_v20  ;;  %v1519_v27 = vmul.f32 0.125, %v1504_v40 }
 0x3ce   : > { %v1517_v14 = vmul.f32 0.125, %v1490_v42  ;;  %v1497_v8 = vadd.f32 %v1496_v47, %v1495_v36 }
 0x3cf   : > { %v1520_v58 = vmul.f32 0.125, %v1511_v35 }
 0x3d0   : > { %1537 = vrot.lane.b32.xlu0 %v1517_v14, %s2629_s17  ;;  %v2088_v24 = vsel %vm1687_vm8, %v1517_v14, %v2087_v6  ;;  %v1518_v46 = vmul.f32 0.125, %v1497_v8 }
 0x3d2   : > { %1539 = vrot.lane.b32.xlu1 %v1518_v46, %s2629_s17  ;;  %v2089_v12 = vsel %vm1689_vm10, %v1518_v46, %v2088_v24 }
 0x3d3   : > { %v2090_v26 = vsel %vm1691_vm9, %v1519_v27, %v2089_v12 }
 0x3d4   : > { %1541 = vrot.lane.b32.xlu0 %v1519_v27, %s2629_s17  ;;  %v3938_v28 = vsel %vm1693_vm15, %v1520_v58, %v2090_v26  ;;  %v3966_v26 = vsub.s32 %v4255_v23, %v3792_v19 }
 0x3d6   : > { %1543 = vrot.lane.b32.xlu1 %v1520_v58, %s2629_s17 }
 0x3f2   : > { %v1534_v55 = vpop.permute.xlu0 %1533 }
 0x3f3   : > { %v1555_v6 = vmul.f32 %v1534_v55, %v3895_v53 }
 0x3f4   : > { %v1536_v16 = vpop.permute.xlu1 %1535 }
 0x3f5   : > { %v1556_v44 = vmul.f32 %v1536_v16, %v3901_v34  ;;  %1573 = vrot.lane.b32.xlu0 %v1555_v6, %s2630_s21 }
 0x3f6   : > { %v1530_v18 = vpop.permute.xlu0 %1529 }
 0x3f7   : > { %v1553_v21 = vmul.f32 %v1530_v18, %v3897_v43  ;;  %1575 = vrot.lane.b32.xlu1 %v1556_v44, %s2630_s21 }
 0x3f8   : > { %v1532_v50 = vpop.permute.xlu1 %1531 }
 0x3f9   : > { %v1554_v10 = vmul.f32 %v1532_v50, %v3905_v49  ;;  %1569 = vrot.lane.b32.xlu0 %v1553_v21, %s2630_s21 }
 0x3fb   : > { %1571 = vrot.lane.b32.xlu1 %v1554_v10, %s2630_s21 }
 0x442   : > { %v1538_v30 = vpop.permute.xlu0 %1537 }
 0x443   : > { %v1557_v53 = vmul.f32 %v1538_v30, %v3920_v33 }
 0x444   : > { %v1540_v2 = vpop.permute.xlu1 %1539 }
 0x445   : > { %v1558_v34 = vmul.f32 %v1540_v2, %v1445_v29  ;;  %1577 = vrot.lane.b32.xlu0 %v1557_v53, %s2630_s21 }
 0x446   : > { %v1542_v38 = vpop.permute.xlu0 %1541 }
 0x447   : > { %v1559_v60 = vmul.f32 %v1542_v38, %v3918_v9  ;;  %1579 = vrot.lane.b32.xlu1 %v1558_v34, %s2630_s21 }
 0x448   : > { %v1544_v43 = vpop.permute.xlu1 %1543 }
 0x449   : > { %v1560_v32 = vmul.f32 %v1544_v43, %v3924_v62  ;;  %1581 = vrot.lane.b32.xlu0 %v1559_v60, %s2630_s21 }
 0x44b   : > { %1583 = vrot.lane.b32.xlu1 %v1560_v32, %s2630_s21 }
 0x467   : > { %v1574_v49 = vpop.permute.xlu0 %1573 }
 0x468   : > { %v1599_v61 = vsel %vm1201_vm1, %v1574_v49, 0.0 }
 0x469   : > { %v1576_v33 = vpop.permute.xlu1 %1575  ;;  %1600 = vadd.xlane.f32.xlu0 %v1599_v61 }
 0x46a   : > { %v1602_v13 = vsel %vm1201_vm1, %v1576_v33, 0.0 }
 0x46b   : > { %v1570_v29 = vpop.permute.xlu0 %1569 }
 0x46c   : > { %v1593_v59 = vsel %vm1201_vm1, %v1570_v29, 0.0 }
 0x46d   : > { %v1572_v20 = vpop.permute.xlu1 %1571  ;;  %1594 = vadd.xlane.f32.xlu0 %v1593_v59 }
 0x46e   : > { %v1596_v9 = vsel %vm1201_vm1, %v1572_v20, 0.0 }
 0x46f   : > { %1597 = vadd.xlane.f32.xlu1 %v1596_v9 }
 0x471   : > { %1603 = vadd.xlane.f32.xlu0 %v1602_v13 }
 0x4b7   : > { %v1578_v62 = vpop.permute.xlu0 %1577 }
 0x4b8   : > { %v1605_v36 = vsel %vm1201_vm1, %v1578_v62, 0.0 }
 0x4b9   : > { %v1580_v15 = vpop.permute.xlu1 %1579  ;;  %1606 = vadd.xlane.f32.xlu1 %v1605_v36 }
 0x4ba   : > { %v1608_v17 = vsel %vm1201_vm1, %v1580_v15, 0.0 }
 0x4bb   : > { %1609 = vadd.xlane.f32.xlu0 %v1608_v17  ;;  %v1582_v42 = vpop.permute.xlu0 %1581 }
 0x4bc   : > { %v1611_v47 = vsel %vm1201_vm1, %v1582_v42, 0.0 }
 0x4bd   : > { %v1584_v40 = vpop.permute.xlu1 %1583  ;;  %1612 = vadd.xlane.f32.xlu1 %v1611_v47 }
 0x4be   : > { %v1614_v14 = vsel %vm1201_vm1, %v1584_v40, 0.0 }
 0x4bf   : > { %1615 = vadd.xlane.f32.xlu0 %v1614_v14 }
 0x4f6   : > { %v1601_v8 = vpop.xlane.xlu0 %1600 }
 0x4f7   : > { %v1627_v55 = vmul.f32 0.2, %v1601_v8  ;;  %vm1619_vm0 = vcmp.gt.f32.partialorder %v1601_v8, 0.0 }
 0x4f9   : > { %v1635_v18 = vsel %vm1619_vm0, %v1601_v8, %v1627_v55  ;;  %v2631_v8 = vmov 0  }
 0x4fa   : > { %v1595_v35 = vpop.xlane.xlu0 %1594  ;;  %v1660_v30 = vrot.slane %v1635_v18, %v3966_v26  ;;  %2487 = vset.pattern.permute.xlu1 %v2631_v8  ;;  %2486 = vset.pattern.permute.xlu0 %v2631_v8 }
 0x4fb   : > { %v1625_v27 = vmul.f32 0.2, %v1595_v35  ;;  %vm1617_vm14 = vcmp.gt.f32.partialorder %v1595_v35, 0.0 }
 0x4fc   : > { %v1598_v24 = vpop.xlane.xlu1 %1597 }
 0x4fd   : > { %v1626_v46 = vmul.f32 0.2, %v1598_v24  ;;  %vm1618_vm11 = vcmp.gt.f32.partialorder %v1598_v24, 0.0  ;;  %v1633_v6 = vsel %vm1617_vm14, %v1595_v35, %v1625_v27  ;;  %v3985_v35 = vsub.s32 2, %v3792_v19 }
 0x4fe   : > { %v1604_v58 = vpop.xlane.xlu0 %1603  ;;  %v1652_v21 = vrot.slane %v1633_v6, %v3966_v26 }
 0x4ff   : > { %v1634_v12 = vsel %vm1618_vm11, %v1598_v24, %v1626_v46  ;;  %v1628_v16 = vmul.f32 0.2, %v1604_v58  ;;  %vm1620_vm12 = vcmp.gt.f32.partialorder %v1604_v58, 0.0  ;;  %vm1696_vm11 = vcmask 64512  }
 0x500   : > { %v1656_v44 = vrot.slane %v1634_v12, %v3966_v26  ;;  %v1715_v24 = vsub.s32 3, %v3792_v19 }
 0x501   : > { %v1636_v50 = vsel %vm1620_vm12, %v1604_v58, %v1628_v16 }
 0x502   : > { %v1682_v10 = vsel %vm1681_vm13, %v1656_v44, %v1652_v21  ;;  %v1664_v2 = vrot.slane %v1636_v50, %v3966_v26  ;;  %v1719_v21 = vsub.s32 4, %v3792_v19 }
 0x503   : > { %v1684_v34 = vsel %vm1683_vm5, %v1660_v30, %v1682_v10 }
 0x504   : > { %v1686_v61 = vsel %vm1685_vm6, %v1664_v2, %v1684_v34 }
 0x546   : > { %v1607_v53 = vpop.xlane.xlu1 %1606 }
 0x547   : > { %vm1621_vm2 = vcmp.gt.f32.partialorder %v1607_v53, 0.0  ;;  %v1629_v23 = vmul.f32 0.2, %v1607_v53 }
 0x548   : > { %v1610_v38 = vpop.xlane.xlu0 %1609 }
 0x549   : > { %v1637_v60 = vsel %vm1621_vm2, %v1607_v53, %v1629_v23  ;;  %vm1622_vm7 = vcmp.gt.f32.partialorder %v1610_v38, 0.0  ;;  %v1630_v43 = vmul.f32 0.2, %v1610_v38  ;;  %v1723_v23 = vsub.s32 5, %v3792_v19 }
 0x54a   : > { %v1668_v32 = vrot.slane %v1637_v60, %v3966_v26  ;;  %v1613_v49 = vpop.xlane.xlu1 %1612 }
 0x54b   : > { %v1638_v33 = vsel %vm1622_vm7, %v1610_v38, %v1630_v43  ;;  %vm1623_vm3 = vcmp.gt.f32.partialorder %v1613_v49, 0.0  ;;  %v1631_v29 = vmul.f32 0.2, %v1613_v49 }
 0x54c   : > { %v1672_v59 = vrot.slane %v1638_v33, %v3966_v26  ;;  %v1616_v20 = vpop.xlane.xlu0 %1615  ;;  %v1688_v9 = vsel %vm1687_vm8, %v1668_v32, %v1686_v61 }
 0x54d   : > { %v1639_v13 = vsel %vm1623_vm3, %v1613_v49, %v1631_v29  ;;  %vm1624_vm4 = vcmp.gt.f32.partialorder %v1616_v20, 0.0  ;;  %v1632_v62 = vmul.f32 0.2, %v1616_v20 }
 0x54e   : > { %v1676_v36 = vrot.slane %v1639_v13, %v3966_v26  ;;  %v1690_v15 = vsel %vm1689_vm10, %v1672_v59, %v1688_v9 }
 0x54f   : > { %v1640_v17 = vsel %vm1624_vm4, %v1616_v20, %v1632_v62 }
 0x550   : > { %v1680_v42 = vrot.slane %v1640_v17, %v3966_v26  ;;  %v1692_v47 = vsel %vm1691_vm9, %v1676_v36, %v1690_v15 }
 0x552   : > { %v1694_v40 = vsel %vm1693_vm15, %v1680_v42, %v1692_v47 }
 0x553   : > { %v1697_v14 = vsel %vm1696_vm11, %v1694_v40, -inf }
 0x554   : > { %1698 = vmax.xlane.f32.xlu1 %v1697_v14 }
 0x5e1   : > { %v1699_v46 = vpop.xlane.xlu1 %1698 }
 0x5e2   : > { %v1704_v27 = vrot.slane %v1699_v46, %v3801_v25  ;;  %v1708_v58 = vrot.slane %v1699_v46, %v3890_v5  ;;  %v1712_v55 = vrot.slane %v1699_v46, %v3985_v35  ;;  %v1716_v10 = vrot.slane %v1699_v46, %v1715_v24 }
 0x5e3   : > { %v1720_v34 = vrot.slane %v1699_v46, %v1719_v21 }
 0x5e4   : > { %v1741_v16 = vsub.f32 %v1633_v6, %v1704_v27  ;;  %v1742_v44 = vsub.f32 %v1634_v12, %v1708_v58  ;;  %v1743_v30 = vsub.f32 %v1635_v18, %v1712_v55  ;;  %v1744_v38 = vsub.f32 %v1636_v50, %v1716_v10 }
 0x5e5   : > { %v1727_v6 = vsub.s32 6, %v3792_v19  ;;  %v1724_v12 = vrot.slane %v1699_v46, %v1723_v23  ;;  %v1745_v32 = vsub.f32 %v1637_v60, %v1720_v34  ;;  %v1731_v18 = vsub.s32 7, %v3792_v19 }
 0x5e6   : > { %v1749_v53 = vmul.f32 1.442695, %v1741_v16  ;;  %v1751_v2 = vmul.f32 1.442695, %v1742_v44  ;;  %v1753_v43 = vmul.f32 1.442695, %v1743_v30  ;;  %v1320_v19 = vadd.f32 %v3858_v22, %v3806_v11 }
 0x5e7   : > { %v1755_v49 = vmul.f32 1.442695, %v1744_v38  ;;  %v1728_v61 = vrot.slane %v1699_v46, %v1727_v6  ;;  %v1746_v29 = vsub.f32 %v1638_v33, %v1724_v12  ;;  %v1757_v59 = vmul.f32 1.442695, %v1745_v32 }
 0x5e8   : > { %2527 = vpow2.f32 %v1749_v53  ;;  %v1732_v9 = vrot.slane %v1699_v46, %v1731_v18 }
 0x5e9   : > { %2529 = vpow2.f32 %v1751_v2  ;;  %v1747_v62 = vsub.f32 %v1639_v13, %v1728_v61  ;;  %v1759_v60 = vmul.f32 1.442695, %v1746_v29 }
 0x5ea   : > { %2531 = vpow2.f32 %v1753_v43  ;;  %v1748_v15 = vsub.f32 %v1640_v17, %v1732_v9 }
 0x5eb   : > { %2533 = vpow2.f32 %v1755_v49  ;;  %v1761_v42 = vmul.f32 1.442695, %v1747_v62 }
 0x5ec   : > { %2535 = vpow2.f32 %v1757_v59  ;;  %v1763_v33 = vmul.f32 1.442695, %v1748_v15 }
 0x5ed   : > { %2537 = vpow2.f32 %v1759_v60 }
 0x5ee   : > { %2539 = vpow2.f32 %v1761_v42  ;;  %v1307_v42 = vadd.f32 %v3887_v48, %v3806_v11 }
 0x5ef   : > { %2541 = vpow2.f32 %v1763_v33  ;;  %v1328_v33 = vadd.f32 %v3862_v52, %v3806_v11 }
 0x5f2   : > { %v2528_v20 = vpop.eup %2527 }
 0x5f3   : > { %v2530_v50 = vpop.eup %2529  ;;  %1774 = vperm.xlu0 %2486, %v2528_v20  }
 0x5f4   : > { %1777 = vperm.xlu1 %2487, %v2530_v50   ;;  %v2532_v36 = vpop.eup %2531 }
 0x5f5   : > { %v2534_v47 = vpop.eup %2533 }
 0x5f6   : > { %v2536_v40 = vpop.eup %2535 }
 0x5f7   : > { %v2538_v14 = vpop.eup %2537 }
 0x5f8   : > { %1780 = vperm.xlu1 %2487, %v2532_v36   ;;  %v2540_v8 = vpop.eup %2539 }
 0x5f9   : > { %v2542_v46 = vpop.eup %2541 }
 0x5fc   : > { %1783 = vperm.xlu1 %2487, %v2534_v47  }
 0x600   : > { %1786 = vperm.xlu1 %2487, %v2536_v40  }
 0x604   : > { %1789 = vperm.xlu1 %2487, %v2538_v14  }
 0x608   : > { %1792 = vperm.xlu1 %2487, %v2540_v8  }
 0x60c   : > { %1795 = vperm.xlu1 %2487, %v2542_v46  }
 0x672   : > { %v1775_v17 = vpop.permute.xlu0 %1774 }
 0x673   : > { %v1778_v13 = vpop.permute.xlu1 %1777  ;;  %v1800_v10 = vrot.slane %v1775_v17, %v3966_v26 }
 0x674   : > { %v1804_v44 = vrot.slane %v1778_v13, %v3966_v26 }
 0x676   : > { %v1829_v38 = vsel %vm1681_vm13, %v1804_v44, %v1800_v10 }
 0x677   : > { %v1781_v27 = vpop.permute.xlu1 %1780 }
 0x678   : > { %v1808_v30 = vrot.slane %v1781_v27, %v3966_v26 }
 0x67a   : > { %v1830_v12 = vsel %vm1683_vm5, %v1808_v30, %v1829_v38 }
 0x67b   : > { %v1784_v58 = vpop.permute.xlu1 %1783 }
 0x67c   : > { %v1812_v53 = vrot.slane %v1784_v58, %v3966_v26 }
 0x67e   : > { %v1831_v49 = vsel %vm1685_vm6, %v1812_v53, %v1830_v12 }
 0x67f   : > { %v1787_v55 = vpop.permute.xlu1 %1786 }
 0x680   : > { %v1816_v2 = vrot.slane %v1787_v55, %v3966_v26 }
 0x682   : > { %v1832_v61 = vsel %vm1687_vm8, %v1816_v2, %v1831_v49 }
 0x683   : > { %v1790_v16 = vpop.permute.xlu1 %1789 }
 0x684   : > { %v1820_v43 = vrot.slane %v1790_v16, %v3966_v26 }
 0x686   : > { %v1833_v59 = vsel %vm1689_vm10, %v1820_v43, %v1832_v61 }
 0x687   : > { %v1793_v34 = vpop.permute.xlu1 %1792 }
 0x688   : > { %v1824_v32 = vrot.slane %v1793_v34, %v3966_v26 }
 0x68a   : > { %v1834_v62 = vsel %vm1691_vm9, %v1824_v32, %v1833_v59 }
 0x68b   : > { %v1796_v29 = vpop.permute.xlu1 %1795 }
 0x68c   : > { %v1828_v9 = vrot.slane %v1796_v29, %v3966_v26 }
 0x68e   : > { %v1835_v60 = vsel %vm1693_vm15, %v1828_v9, %v1834_v62 }
 0x68f   : > { %v1837_v15 = vsel %vm1696_vm11, %v1835_v60, 0.0 }
 0x690   : > { %1838 = vadd.xlane.f32.xlu1 %v1837_v15 }
 0x6a1   : > { %2099 = vrot.lane.b32.xlu1 %v1307_v42, %s2629_s17 }
 0x6a5   : > { %2119 = vrot.lane.b32.xlu1 %v1328_v33, %s2630_s21 }
 0x71d   : > { %v1839_v13 = vpop.xlane.xlu1 %1838 }
 0x71e   : > { %2543 = vrcp.f32 %v1839_v13 }
 0x728   : > { %v2544_v26 = vpop.eup %2543 }
 0x729   : > { %v1845_v27 = vrot.slane %v2544_v26, %v3801_v25  ;;  %v1849_v55 = vrot.slane %v2544_v26, %v3890_v5  ;;  %v1853_v16 = vrot.slane %v2544_v26, %v3985_v35  ;;  %v1857_v44 = vrot.slane %v2544_v26, %v1715_v24 }
 0x72a   : > { %v1861_v10 = vrot.slane %v2544_v26, %v1719_v21  ;;  %v1865_v25 = vrot.slane %v2544_v26, %v1723_v23  ;;  %v1873_v24 = vrot.slane %v2544_v26, %v1731_v18  ;;  %v1304_v21 = vadd.f32 %v3885_v7, %v3806_v11  ;;  %v2493_v7 = vld [vmem:[%s4161_s1 + $0x28] sm:$0xff]  }
 0x72b   : > { %v1882_v58 = vmul.f32 %v2528_v20, %v1845_v27  ;;  %v1883_v17 = vmul.f32 %v2530_v50, %v1849_v55  ;;  %v1884_v48 = vmul.f32 %v2532_v36, %v1853_v16  ;;  %v1885_v52 = vmul.f32 %v2534_v47, %v1857_v44  ;;  %2352 = vmatpush3.bf16.msra.mxu1 %v2493_v7 }
 0x72c   : > { %v1886_v30 = vmul.f32 %v2536_v40, %v1861_v10  ;;  %v1887_v5 = vmul.f32 %v2538_v14, %v1865_v25  ;;  %v1869_v20 = vrot.slane %v2544_v26, %v1727_v6  ;;  %v1889_v36 = vmul.f32 %v2542_v46, %v1873_v24  ;;  %2353 = vmatprep.subr.bf16.mxu1 %v4237_v31 }
 0x72d   : > { %1892 = vperm.xlu0 %2486, %v1882_v58   ;;  %v1312_v23 = vadd.f32 %v3842_v3, %v3806_v11  ;;  %v1315_v6 = vadd.f32 %v3848_v56, %v3806_v11  ;;  %v1323_v18 = vadd.f32 %v3860_v4, %v3806_v11  ;;  %v2494_v3 = vld [vmem:[%s4161_s1 + $0x30] sm:$0xff]  }
 0x72e   : > { %v1888_v50 = vmul.f32 %v2540_v8, %v1869_v20 }
 0x72f   : > { %2354 = vmatpush3.bf16.msra.mxu1 %v2494_v3 }
 0x731   : > { %1897 = vperm.xlu0 %2486, %v1883_v17  }
 0x735   : > { %1902 = vperm.xlu0 %2486, %v1884_v48  }
 0x739   : > { %1907 = vperm.xlu0 %2486, %v1885_v52  }
 0x73d   : > { %1912 = vperm.xlu0 %2486, %v1886_v30  }
 0x741   : > { %1917 = vperm.xlu0 %2486, %v1887_v5  }
 0x745   : > { %1922 = vperm.xlu0 %2486, %v1888_v50  }
 0x749   : > { %1927 = vperm.xlu0 %2486, %v1889_v36  }
 0x74d   : > { %2097 = vrot.lane.b32.xlu0 %v1304_v21, %s2629_s17 }
 0x751   : > { %2101 = vrot.lane.b32.xlu0 %v1312_v23, %s2629_s17  ;;  %s2557_s17 = sshll.u32 %s2633_s16, 4  ;;  %s2558_s17 = int_to_ptr.vmem [resolvable:$false] %s2557_s17 }
 0x752   : > { %p2560_p0 = scmp.lt.s32.totalorder %s4106_s4, %s2558_s17 }
 0x755   : > { %2109 = vrot.lane.b32.xlu0 %v1315_v6, %s2632_s22 }
 0x759   : > { %2111 = vrot.lane.b32.xlu0 %v1320_v19, %s2632_s22 }
 0x75d   : > { %2113 = vrot.lane.b32.xlu0 %v1323_v18, %s2632_s22 }
 0x761   : > { %2121 = vrot.lane.b32.xlu0 %v4237_v31, %s2630_s21  ;;  %s2559_s21 = scalar_lea.vmem %s2558_s17, 768 }
 0x762   : > { %p2561_p1 = scmp.lt.s32.totalorder %s2559_s21, %s2553_s14 }
 0x764   : > { %p2562_p2 = por %p2561_p1, %p2560_p0 }
 0x766   : > { %p2563_p3 = pnand %p2562_p2, %p2556_p13 }
 0x7ac   : > { %v1893_v56 = vpop.permute.xlu0 %1892 }
 0x7ad   : > { %v1930_v4 = vmul.f32 %v1893_v56, %v3809_v41 }
 0x7af   : > { %v1938_v8 = vsel %vm1201_vm1, %v1930_v4, 0.0 }
 0x7b0   : > { %v1898_v22 = vpop.permute.xlu0 %1897  ;;  %v1939_v34 = vrot.slane %v1938_v8, 4 }
 0x7b1   : > { %v1931_v47 = vmul.f32 %v1898_v22, %v3813_v57 }
 0x7b2   : > { %v1940_v57 = vadd.f32 %v1939_v34, %v1938_v8 }
 0x7b3   : > { %v1945_v40 = vsel %vm1201_vm1, %v1931_v47, 0.0 }
 0x7b4   : > { %v1903_v14 = vpop.permute.xlu0 %1902  ;;  %v1946_v53 = vrot.slane %v1945_v40, 4  ;;  %v1941_v60 = vrot.slane %v1940_v57, 2 }
 0x7b5   : > { %v1932_v46 = vmul.f32 %v1903_v14, %v3825_v51 }
 0x7b6   : > { %v1947_v12 = vadd.f32 %v1946_v53, %v1945_v40  ;;  %v1942_v55 = vadd.f32 %v1941_v60, %v1940_v57 }
 0x7b7   : > { %v1952_v2 = vsel %vm1201_vm1, %v1932_v46, 0.0 }
 0x7b8   : > { %v1953_v38 = vrot.slane %v1952_v2, 4  ;;  %v1908_v31 = vpop.permute.xlu0 %1907  ;;  %v1948_v59 = vrot.slane %v1947_v12, 2  ;;  %v1943_v20 = vrot.slane %v1942_v55, 1 }
 0x7b9   : > { %v1933_v43 = vmul.f32 %v1908_v31, %v3829_v45 }
 0x7ba   : > { %v1954_v32 = vadd.f32 %v1953_v38, %v1952_v2  ;;  %v1949_v13 = vadd.f32 %v1948_v59, %v1947_v12  ;;  %v1944_v3 = vadd.f32 %v1943_v20, %v1942_v55 }
 0x7bb   : > { %v1959_v41 = vsel %vm1201_vm1, %v1933_v43, 0.0 }
 0x7bc   : > { %v1960_v49 = vrot.slane %v1959_v41, 4  ;;  %v1913_v61 = vpop.permute.xlu0 %1912  ;;  %v1955_v51 = vrot.slane %v1954_v32, 2  ;;  %v1950_v52 = vrot.slane %v1949_v13, 1 }
 0x7bd   : > { %v1934_v29 = vmul.f32 %v1913_v61, %v3840_v54 }
 0x7be   : > { %v1961_v9 = vadd.f32 %v1960_v49, %v1959_v41  ;;  %v1956_v27 = vadd.f32 %v1955_v51, %v1954_v32  ;;  %v1951_v6 = vadd.f32 %v1950_v52, %v1949_v13 }
 0x7bf   : > { %v1966_v62 = vsel %vm1201_vm1, %v1934_v29, 0.0 }
 0x7c0   : > { %v1962_v15 = vrot.slane %v1961_v9, 2  ;;  %v1967_v42 = vrot.slane %v1966_v62, 4  ;;  %v1918_v33 = vpop.permute.xlu0 %1917  ;;  %v1957_v30 = vrot.slane %v1956_v27, 1  ;;  %v1995_v8 = vpack.c.bf16 %v1951_v6, %v1951_v6 }
 0x7c1   : > { %v1935_v45 = vmul.f32 %v1918_v33, %v3846_v1 }
 0x7c2   : > { %v1968_v26 = vadd.f32 %v1967_v42, %v1966_v62  ;;  %v1963_v17 = vadd.f32 %v1962_v15, %v1961_v9  ;;  %v1958_v18 = vadd.f32 %v1957_v30, %v1956_v27  ;;  %v2015_v41 = vunpack.c.l.b16 %v1995_v8 }
 0x7c3   : > { %v1973_v58 = vsel %vm1201_vm1, %v1935_v45, 0.0  ;;  %v1296_v30 = vadd.f32 %v3878_v0, %v3806_v11 }
 0x7c4   : > { %v1969_v16 = vrot.slane %v1968_v26, 2  ;;  %v1923_v54 = vpop.permute.xlu0 %1922  ;;  %v1974_v48 = vrot.slane %v1973_v58, 4  ;;  %v1964_v1 = vrot.slane %v1963_v17, 1  ;;  %v1996_v2 = vpack.c.bf16 %v1958_v18, %v1958_v18 }
 0x7c5   : > { %v1936_v44 = vmul.f32 %v1923_v54, %v3865_v39 }
 0x7c6   : > { %v1970_v10 = vadd.f32 %v1969_v16, %v1968_v26  ;;  %v1975_v25 = vadd.f32 %v1974_v48, %v1973_v58  ;;  %v1965_v56 = vadd.f32 %v1964_v1, %v1963_v17  ;;  %v2016_v29 = vunpack.c.l.b16 %v1996_v2 }
 0x7c7   : > { %v1980_v5 = vsel %vm1201_vm1, %v1936_v44, 0.0  ;;  %v2100_v44 = vpop.permute.xlu1 %2099 }
 0x7c8   : > { %v1981_v50 = vrot.slane %v1980_v5, 4  ;;  %v1928_v24 = vpop.permute.xlu0 %1927  ;;  %v1971_v36 = vrot.slane %v1970_v10, 1  ;;  %v1976_v21 = vrot.slane %v1975_v25, 2  ;;  %v1997_v38 = vpack.c.bf16 %v1965_v56, %v1965_v56 }
 0x7c9   : > { %v1937_v23 = vmul.f32 %v1928_v24, %v3869_v37  ;;  %v1994_v37 = vpack.c.bf16 %v1944_v3, %v1944_v3  ;;  %v2126_v20 = vsel %vm1201_vm1, %v1296_v30, %v2100_v44 }
 0x7ca   : > { %v1982_v19 = vadd.f32 %v1981_v50, %v1980_v5  ;;  %v1977_v7 = vadd.f32 %v1976_v21, %v1975_v25  ;;  %v1972_v40 = vadd.f32 %v1971_v36, %v1970_v10  ;;  %v2017_v9 = vunpack.c.l.b16 %v1997_v38 }
 0x7cb   : > { %v1987_v39 = vsel %vm1201_vm1, %v1937_v23, 0.0  ;;  %v2014_v59 = vunpack.c.l.b16 %v1994_v37  ;;  %v1299_v25 = vadd.f32 %v3881_v63, %v3806_v11  ;;  %v176_v11 = vld [vmem:[%s4161_s1 + $0x38] sm:$0x2] }
 0x7cc   : > { %v1983_v22 = vrot.slane %v1982_v19, 2  ;;  %v1988_v4 = vrot.slane %v1987_v39, 4  ;;  %v4077_v47 = vpop.permute.xlu0 %2097  ;;  %v1978_v14 = vrot.slane %v1977_v7, 1  ;;  %v1998_v32 = vpack.c.bf16 %v1972_v40, %v1972_v40 }
 0x7cd   : > { %v2022_v42 = vsel %vm1681_vm13, %v2015_v41, %v2014_v59  ;;  %vm2128_vm13 = vcmask 523264   ;;  %v177_v63 = vunpack.c.l.bf16 %v176_v11 }
 0x7ce   : > { %v1984_v46 = vadd.f32 %v1983_v22, %v1982_v19  ;;  %v1989_v53 = vadd.f32 %v1988_v4, %v1987_v39  ;;  %v1979_v34 = vadd.f32 %v1978_v14, %v1977_v7  ;;  %v2018_v15 = vunpack.c.l.b16 %v1998_v32 }
 0x7cf   : > { %v2023_v13 = vsel %vm1683_vm5, %v2016_v29, %v2022_v42  ;;  %vm2132_vm5 = vcmask 785408   ;;  %v2005_v23 = vrot.slane %v177_v63, %v3985_v35  ;;  %v2120_v35 = vpop.permute.xlu1 %2119 }
 0x7d0   : > { %v1985_v31 = vrot.slane %v1984_v46, 1  ;;  %v1990_v43 = vrot.slane %v1989_v53, 2  ;;  %v2102_v12 = vpop.permute.xlu0 %2101  ;;  %v1999_v57 = vpack.c.bf16 %v1979_v34, %v1979_v34  ;;  %v2024_v27 = vsel %vm1685_vm6, %v2017_v9, %v2023_v13 }
 0x7d1   : > { %v2025_v17 = vsel %vm1687_vm8, %v2018_v15, %v2024_v27  ;;  %v2127_v1 = vsel %vm1201_vm1, %v1299_v25, %v2102_v12 }
 0x7d2   : > { %v1986_v49 = vadd.f32 %v1985_v31, %v1984_v46  ;;  %v1991_v61 = vadd.f32 %v1990_v43, %v1989_v53  ;;  %v2019_v33 = vunpack.c.l.b16 %v1999_v57 }
 0x7d4   : > { %v2000_v51 = vpack.c.bf16 %v1986_v49, %v1986_v49  ;;  %v1992_v62 = vrot.slane %v1991_v61, 1  ;;  %v2110_v60 = vpop.permute.xlu0 %2109  ;;  %v2026_v16 = vsel %vm1689_vm10, %v2019_v33, %v2025_v17 }
 0x7d6   : > { %v1993_v45 = vadd.f32 %v1992_v62, %v1991_v61  ;;  %v2020_v26 = vunpack.c.l.b16 %v2000_v51 }
 0x7d8   : > { %v2001_v58 = vpack.c.bf16 %v1993_v45, %v1993_v45  ;;  %v2112_v55 = vpop.permute.xlu0 %2111  ;;  %v2027_v48 = vsel %vm1691_vm9, %v2020_v26, %v2026_v16 }
 0x7d9   : > { %v2130_v50 = vsel %vm2128_vm13, %v2126_v20, %v2112_v55 }
 0x7da   : > { %v2021_v54 = vunpack.c.l.b16 %v2001_v58 }
 0x7dc   : > { %v2028_v52 = vsel %vm1693_vm15, %v2021_v54, %v2027_v48  ;;  %v2114_v10 = vpop.permute.xlu0 %2113 }
 0x7dd   : > { %v2029_v5 = vpack.c.b16 %v2028_v52, %v2028_v52  ;;  %v2131_v24 = vsel %vm2128_vm13, %v2127_v1, %v2114_v10 }
 0x7df   : > { %2356 = vmatmul.mubr.msk.bf16.vlgmr.msra.gmra.mrb[20].mxu1 %vm1201_vm1, %v2029_v5 }
 0x7e0   : > { %v2122_v36 = vpop.permute.xlu0 %2121 }
 0x7e1   : > { %v2134_v0 = vsel %vm2132_vm5, %v2130_v50, %v2122_v36  ;;  %v2135_v21 = vsel %vm2132_vm5, %v2131_v24, %v2122_v36 }
 0x7e2   : > { %2137 = vst [vmem:[%s136_s29 + $0x8] sm:$0xff] %v2134_v0  ;;  %2138 = vst [vmem:[%s136_s29 + $0x10] sm:$0xff] %v2135_v21 }
 0x8b2   : > { %v2079_v6 = vpop.f32.mrb[20].mxu1 }
 0x8b3   : > { %v2080_v19 = vadd.f32 %v2079_v6, %v2005_v23  ;;  %v2357_v18 = vpop.f32.mrb[21].mxu1 }
 0x8b4   : > { %v2082_v7 = vpop.f32.mrb[22].mxu1 }
 0x8b5   : > { %v2093_v39 = vadd.f32 %v3938_v28, %v2080_v19  ;;  %v2358_v3 = vpop.f32.mrb[23].mxu1 }
 0x8b7   : > { %v2125_v56 = vsel %vm1201_vm1, %v2093_v39, %v4077_v47 }
 0x8b8   : > { %v2129_v22 = vsel %vm2128_vm13, %v2125_v56, %v2110_v60 }
 0x8b9   : > { %v2133_v4 = vsel %vm2132_vm5, %v2129_v22, %v2120_v35 }
 0x8ba   : > { %2136 = vst [vmem:[%s136_s29] sm:$0xff] %v2133_v4 }
 0x8bb   : > { %2566 = shalt.err (!%p2563_p3)
}
 0x8bc   : > { %s2567_s22 = scalar_lea.hbm %s4114_s8, 384  ;;  %s2571_s25 = scalar_lea.hbm %s4162_s2, 1536 }
 0x8bd   : > { %p2568_p4 = scmp.ne.s32.totalorder %s4114_s8, %s2567_s22  ;;  %p2572_p9 = scmp.lt.u32.totalorder %s4114_s8, %s4162_s2 }
 0x8be   : > { %p2573_p10 = scmp.lt.u32.totalorder %s2571_s25, %s2567_s22  ;;  %p2575_p12 = scmp.lt.u32.totalorder %s2567_s22, %s4114_s8 }
 0x8bf   : > { %p2569_p7 = pnand %p2568_p4, %p2689_p5 }
 0x8c0   : > { %p2574_p11 = por %p2573_p10, %p2572_p9 }
 0x8c1   : > { %p2570_p8 = pneg %p2569_p7 }
 0x8c2   : > { %p2576_p13 = por %p2575_p12, %p2574_p11 }
 0x8c4   : > { %p2577_p0 = pnand %p2576_p13, %p2570_p8 }
 0x8c6   : > { %2580 = shalt.err (!%p2577_p0)
}
 0x8c7   : > { %s2634_s28 = smov 128   ;;  %s2635_s29 = smov 8  }
 0x8c8   : > { %2398 = dma.vmem_to_hbm [thread:$0]  (%p2689_p5), %s4106_s4, 384, %s4114_s8, %s4119_s13, %s2634_s28, %s2634_s28, %s2635_s29  }
 0x8c9 PF: > { %p2404_p1 = scmp.ge.s32.totalorder %s2615_s12, 2  ;;  %s2168_s30 = sand.u32 1, %s2603_s9  }
 0x8ca   : > { %s2169_s3 = scalar_lea.sflag [#allocation3], %s2168_s30 }
 0x8cb   : > { %p2401_p2 = pnand %p2404_p1, %p2693_p6 }
 0x8cd   : > { %2598 = dma.done.wait (!%p2401_p2), %s2169_s3, 384  }
 0x8ce   : > { %2600 = vsyncadd (!%p2401_p2), %s2169_s3, 4294966912  ;;  %p12_p3 = scmp.ge.s32.totalorder %s2676_s15, 6   ;;  %s4256_s9 = smov %s2607_s10 }
 0x8cf   : > { %s4257_s10 = smov %s2611_s11  ;;  %s4258_s11 = smov %s2687_s18 }
 0x8d0   : > { %s4259_s12 = smov %s2676_s15  ;;  %14 = sbr.rel (!%p12_p3) target bundleno = 3 (0x3), region = 63 }
 0x8d7   :  { %2174 = vsyncpa [#allocation3], 1 }
 0x8d8   :  { %2176 = vsyncpa [#allocation3 + $0x1], 1 }

</bundles_post_ra>
